<compile_context>
chip_gen: v6e
topology: v6e:2x2x1
jax: 0.10.0
libtpu: 0.0.40
codegen_flags: <defaults>
</compile_context>

<pallas_src>
import jax
import jax.numpy as jnp
from jax.experimental import pallas as pl
from jax.experimental.pallas import tpu as pltpu

# logical dims
IMG, HID, LAT = 784, 400, 20
# lane-padded dims (multiples of 128)
IMG_P, HID_P, LAT_P = 896, 512, 128
HEADS_P = 2 * LAT_P  # fused mu|logvar output columns


def _round_up(n, m):
    return ((n + m - 1) // m) * m


def _vae_kernel(x_ref,
                w1_ref, b1_ref,          # encoder fc1: 896 -> 512 (784 -> 400 valid)
                wh_ref, bh_ref,          # fused heads: 512 -> 256 (mu | logvar)
                wd1_ref, bd1_ref,        # decoder fc1: 128 -> 512 (20 -> 400 valid)
                wd2_ref, bd2_ref,        # decoder fc2: 512 -> 896 (400 -> 784 valid)
                eps_ref,                 # N(0,1) noise tile, (TB, 128) f32
                recon_ref, mu_ref, logvar_ref):
    x = x_ref[...]                                                     # (TB, 896) bf16

    # ---- encoder fc1 + ReLU (bf16 MXU operands, f32 accumulation) ----
    h = jnp.dot(x, w1_ref[...], preferred_element_type=jnp.float32) + b1_ref[...]
    h = jnp.maximum(h, 0.0)                                            # (TB, 512) f32

    # ---- fused mu|logvar heads: one matmul, lane-aligned split ----
    y = jnp.dot(h.astype(jnp.bfloat16), wh_ref[...],
                preferred_element_type=jnp.float32) + bh_ref[...]      # (TB, 256) f32
    mu = y[:, :LAT_P]
    logvar = y[:, LAT_P:]

    # ---- reparameterize (f32 elementwise) ----
    sigma = jnp.exp(0.5 * logvar)
    z = mu + eps_ref[...] * sigma                                      # (TB, 128) f32

    # ---- decoder ----
    hd = jnp.dot(z.astype(jnp.bfloat16), wd1_ref[...],
                 preferred_element_type=jnp.float32) + bd1_ref[...]
    hd = jnp.maximum(hd, 0.0)                                          # (TB, 512) f32
    logits = jnp.dot(hd.astype(jnp.bfloat16), wd2_ref[...],
                     preferred_element_type=jnp.float32) + bd2_ref[...]  # (TB, 896) f32

    # sigmoid = 1 / (1 + exp(-x)); exp + approx reciprocal both go to the EUP
    recon_ref[...] = pl.reciprocal(1.0 + jnp.exp(-logits), approx=True)
    mu_ref[...] = mu
    logvar_ref[...] = logvar


def vae_forward(x, params, eps):
    """x: (B, 1, 28, 28) float32. Returns (recon (B,784), mu (B,20), logvar (B,20))."""
    x2 = x.reshape(-1, IMG).astype(jnp.float32)
    B = x2.shape[0]

    # Batch tile: 256 is MXU-friendly and VMEM-safe on v5e/v6e/v7x default
    # scoped limits (resident bf16 weights ~2.2 MB + double-buffered tiles).
    TB = min(256, _round_up(B, 8))
    B_pad = _round_up(B, TB)
    grid = (B_pad // TB,)

    # Lane-dense, batch-padded input slabs (x in bf16 halves its DMA bytes).
    xp = jnp.zeros((B_pad, IMG_P), jnp.bfloat16).at[:B, :IMG].set(x2.astype(jnp.bfloat16))
    ep = jnp.zeros((B_pad, LAT_P), jnp.float32).at[:B, :LAT].set(eps.astype(jnp.float32))

    def row_spec(cols):  # batch-tiled activations
        return pl.BlockSpec((TB, cols), lambda i: (i, 0))

    def resident(arr):   # weights/biases: constant block -> DMA'd once, stays in VMEM
        return pl.BlockSpec(arr.shape, lambda i: (0, 0))

    flops = 2 * B_pad * (IMG_P * HID_P + HID_P * HEADS_P + LAT_P * HID_P + HID_P * IMG_P)
    transcendentals = B_pad * (LAT_P + 2 * IMG_P)
    bytes_accessed = (
        xp.size * 2 + ep.size * 4
        + sum(int(v.size) * v.dtype.itemsize for v in params.values())
        + B_pad * (IMG_P + 2 * LAT_P) * 4
    )

    recon, mu, logvar = pl.pallas_call(
        _vae_kernel,
        out_shape=(
            jax.ShapeDtypeStruct((B_pad, IMG_P), jnp.float32),
            jax.ShapeDtypeStruct((B_pad, LAT_P), jnp.float32),
            jax.ShapeDtypeStruct((B_pad, LAT_P), jnp.float32),
        ),
        grid_spec=pltpu.PrefetchScalarGridSpec(
            num_scalar_prefetch=0,
            grid=grid,
            in_specs=[
                row_spec(IMG_P),
                resident(params["w1"]), resident(params["b1"]),
                resident(params["wh"]), resident(params["bh"]),
                resident(params["wd1"]), resident(params["bd1"]),
                resident(params["wd2"]), resident(params["bd2"]),
                row_spec(LAT_P),
            ],
            out_specs=(row_spec(IMG_P), row_spec(LAT_P), row_spec(LAT_P)),
        ),
        compiler_params=pltpu.CompilerParams(dimension_semantics=("parallel",)),
        cost_estimate=pl.CostEstimate(flops=flops,
                                      transcendentals=transcendentals,
                                      bytes_accessed=bytes_accessed),
    )(
        xp,
        params["w1"], params["b1"],
        params["wh"], params["bh"],
        params["wd1"], params["bd1"],
        params["wd2"], params["bd2"],
        ep,
    )
    # Slice padded slabs back to logical shapes.
    return recon[:B, :IMG], mu[:B, :LAT], logvar[:B, :LAT]


def _init_linear(key, fan_in, fan_out):
    # PyTorch nn.Linear default init: U(-1/sqrt(fan_in), 1/sqrt(fan_in)).
    kw, kb = jax.random.split(key)
    bound = 1.0 / jnp.sqrt(jnp.float32(fan_in))
    w = jax.random.uniform(kw, (fan_in, fan_out), jnp.float32, -bound, bound)
    b = jax.random.uniform(kb, (1, fan_out), jnp.float32, -bound, bound)
    return w, b


def _pad2(a, rows, cols):
    return jnp.pad(a, ((0, rows - a.shape[0]), (0, cols - a.shape[1])))


def init_params(key):
    """Returns (kernel_params, reference_params).

    kernel_params: lane-padded, mu|logvar-fused, bf16 weights / f32 biases.
    reference_params: raw unpadded f32 copies for the pure-JAX check.
    """
    keys = jax.random.split(key, 5)
    w1, b1 = _init_linear(keys[0], IMG, HID)
    wmu, bmu = _init_linear(keys[1], HID, LAT)
    wlv, blv = _init_linear(keys[2], HID, LAT)
    wd1, bd1 = _init_linear(keys[3], LAT, HID)
    wd2, bd2 = _init_linear(keys[4], HID, IMG)

    # Fuse the two 20-wide heads into one lane-padded (512, 256) weight:
    # mu occupies columns [0, 20), logvar occupies [128, 148).
    wh = jnp.zeros((HID_P, HEADS_P), jnp.float32)
    wh = wh.at[:HID, :LAT].set(wmu).at[:HID, LAT_P:LAT_P + LAT].set(wlv)
    bh = jnp.zeros((1, HEADS_P), jnp.float32)
    bh = bh.at[:, :LAT].set(bmu).at[:, LAT_P:LAT_P + LAT].set(blv)

    kernel_params = {
        "w1": _pad2(w1, IMG_P, HID_P).astype(jnp.bfloat16),
        "b1": _pad2(b1, 1, HID_P),
        "wh": wh.astype(jnp.bfloat16),
        "bh": bh,
        "wd1": _pad2(wd1, LAT_P, HID_P).astype(jnp.bfloat16),
        "bd1": _pad2(bd1, 1, HID_P),
        "wd2": _pad2(wd2, HID_P, IMG_P).astype(jnp.bfloat16),
        "bd2": _pad2(bd2, 1, IMG_P),
    }
    reference_params = {
        "w1": w1, "b1": b1, "wmu": wmu, "bmu": bmu, "wlv": wlv, "blv": blv,
        "wd1": wd1, "bd1": bd1, "wd2": wd2, "bd2": bd2,
    }
    return kernel_params, reference_params


def _vae_reference(x, ref, eps):
    """Pure-JAX f32 reference with the same VAE semantics."""
    x2 = x.reshape(-1, IMG)
    h = jnp.maximum(x2 @ ref["w1"] + ref["b1"], 0.0)
    mu = h @ ref["wmu"] + ref["bmu"]
    logvar = h @ ref["wlv"] + ref["blv"]
    z = mu + eps * jnp.exp(0.5 * logvar)
    hd = jnp.maximum(z @ ref["wd1"] + ref["bd1"], 0.0)
    logits = hd @ ref["wd2"] + ref["bd2"]
    return jax.nn.sigmoid(logits), mu, logvar


if __name__ == "__main__":
    root = jax.random.PRNGKey(0)
    k_params, k_x, k_eps = jax.random.split(root, 3)

    B = 2
    x = jax.random.uniform(k_x, (B, 1, 28, 28), jnp.float32)      # NCHW, MNIST-like
    params, ref_params = init_params(k_params)
    eps = jax.random.normal(k_eps, (B, LAT), jnp.float32)         # reparameterization noise

    recon, mu, logvar = vae_forward(x, params, eps)
    jax.block_until_ready((recon, mu, logvar))

    assert recon.shape == (B, IMG) and mu.shape == (B, LAT) and logvar.shape == (B, LAT)
    assert bool(jnp.all(jnp.isfinite(recon)))
    assert bool(jnp.all((recon >= -1e-3) & (recon <= 1.0 + 1e-3)))   # approx-reciprocal slack

    # Correctness vs f32 reference (loose tolerance: bf16 MXU operands).
    r_ref, mu_ref_v, lv_ref_v = _vae_reference(x, ref_params, eps)
    assert float(jnp.max(jnp.abs(recon - r_ref))) < 5e-2
    assert float(jnp.max(jnp.abs(mu - mu_ref_v))) < 5e-2
    assert float(jnp.max(jnp.abs(logvar - lv_ref_v))) < 5e-2

    print("KERNEL_OK")
</pallas_src>

<mosaic_0001>
module attributes {stable_mosaic.version = 11 : i64} {
  func.func @_vae_kernel(%arg0: i32, %arg1: memref<8x896xbf16, #tpu.memory_space<vmem>>, %arg2: memref<896x512xbf16, #tpu.memory_space<vmem>>, %arg3: memref<1x512xf32, #tpu.memory_space<vmem>>, %arg4: memref<512x256xbf16, #tpu.memory_space<vmem>>, %arg5: memref<1x256xf32, #tpu.memory_space<vmem>>, %arg6: memref<128x512xbf16, #tpu.memory_space<vmem>>, %arg7: memref<1x512xf32, #tpu.memory_space<vmem>>, %arg8: memref<512x896xbf16, #tpu.memory_space<vmem>>, %arg9: memref<1x896xf32, #tpu.memory_space<vmem>>, %arg10: memref<8x128xf32, #tpu.memory_space<vmem>>, %arg11: memref<8x896xf32, #tpu.memory_space<vmem>>, %arg12: memref<8x128xf32, #tpu.memory_space<vmem>>, %arg13: memref<8x128xf32, #tpu.memory_space<vmem>>) attributes {dimension_semantics = [#tpu.dimension_semantics<parallel>], iteration_bounds = array<i64: 1>, scalar_prefetch = 0 : i64, scratch_operands = 0 : i64, tpu.core_type = #tpu.core_type<tc>, window_params = [{transform_indices = @transform_0, window_bounds = array<i64: 8, 896>}, {pipeline_mode = #tpu.pipeline_mode<synchronous>, transform_indices = @transform_1, window_bounds = array<i64: 896, 512>}, {pipeline_mode = #tpu.pipeline_mode<synchronous>, transform_indices = @transform_2, window_bounds = array<i64: 1, 512>}, {pipeline_mode = #tpu.pipeline_mode<synchronous>, transform_indices = @transform_3, window_bounds = array<i64: 512, 256>}, {pipeline_mode = #tpu.pipeline_mode<synchronous>, transform_indices = @transform_4, window_bounds = array<i64: 1, 256>}, {pipeline_mode = #tpu.pipeline_mode<synchronous>, transform_indices = @transform_5, window_bounds = array<i64: 128, 512>}, {pipeline_mode = #tpu.pipeline_mode<synchronous>, transform_indices = @transform_6, window_bounds = array<i64: 1, 512>}, {pipeline_mode = #tpu.pipeline_mode<synchronous>, transform_indices = @transform_7, window_bounds = array<i64: 512, 896>}, {pipeline_mode = #tpu.pipeline_mode<synchronous>, transform_indices = @transform_8, window_bounds = array<i64: 1, 896>}, {transform_indices = @transform_9, window_bounds = array<i64: 8, 128>}, {transform_indices = @transform_10, window_bounds = array<i64: 8, 896>}, {transform_indices = @transform_11, window_bounds = array<i64: 8, 128>}, {transform_indices = @transform_12, window_bounds = array<i64: 8, 128>}]} {
    %c0 = arith.constant 0 : index
    %c0_0 = arith.constant 0 : index
    %0 = vector.load %arg1[%c0, %c0_0] : memref<8x896xbf16, #tpu.memory_space<vmem>>, vector<8x896xbf16>
    %c0_1 = arith.constant 0 : index
    %c0_2 = arith.constant 0 : index
    %1 = vector.load %arg2[%c0_1, %c0_2] : memref<896x512xbf16, #tpu.memory_space<vmem>>, vector<896x512xbf16>
    %cst = arith.constant dense<0.000000e+00> : vector<8x512xf32>
    %2 = tpu.matmul %0, %1, %cst {dimension_numbers = #tpu.dot_dimension_numbers<[1], [0], [0], [1], [0, 0, 1, 1], [], []>} : vector<8x896xbf16>, vector<896x512xbf16>, vector<8x512xf32> -> vector<8x512xf32>
    %c0_3 = arith.constant 0 : index
    %c0_4 = arith.constant 0 : index
    %3 = vector.load %arg3[%c0_3, %c0_4] : memref<1x512xf32, #tpu.memory_space<vmem>>, vector<1x512xf32>
    %4 = vector.broadcast %3 : vector<1x512xf32> to vector<8x512xf32>
    %5 = arith.addf %2, %4 : vector<8x512xf32>
    %cst_5 = arith.constant 0.000000e+00 : f32
    %6 = vector.broadcast %cst_5 : f32 to vector<8x512xf32>
    %7 = arith.maximumf %5, %6 : vector<8x512xf32>
    %8 = arith.truncf %7 : vector<8x512xf32> to vector<8x512xbf16>
    %c0_6 = arith.constant 0 : index
    %c0_7 = arith.constant 0 : index
    %9 = vector.load %arg4[%c0_6, %c0_7] : memref<512x256xbf16, #tpu.memory_space<vmem>>, vector<512x256xbf16>
    %cst_8 = arith.constant dense<0.000000e+00> : vector<8x256xf32>
    %10 = tpu.matmul %8, %9, %cst_8 {dimension_numbers = #tpu.dot_dimension_numbers<[1], [0], [0], [1], [0, 0, 1, 1], [], []>} : vector<8x512xbf16>, vector<512x256xbf16>, vector<8x256xf32> -> vector<8x256xf32>
    %c0_9 = arith.constant 0 : index
    %c0_10 = arith.constant 0 : index
    %11 = vector.load %arg5[%c0_9, %c0_10] : memref<1x256xf32, #tpu.memory_space<vmem>>, vector<1x256xf32>
    %12 = vector.broadcast %11 : vector<1x256xf32> to vector<8x256xf32>
    %13 = arith.addf %10, %12 : vector<8x256xf32>
    %14 = vector.extract_strided_slice %13 {offsets = [0, 0], sizes = [8, 128], strides = [1, 1]} : vector<8x256xf32> to vector<8x128xf32>
    %15 = vector.extract_strided_slice %13 {offsets = [0, 128], sizes = [8, 128], strides = [1, 1]} : vector<8x256xf32> to vector<8x128xf32>
    %cst_11 = arith.constant 5.000000e-01 : f32
    %16 = vector.broadcast %cst_11 : f32 to vector<8x128xf32>
    %17 = arith.mulf %16, %15 : vector<8x128xf32>
    %18 = math.exp %17 : vector<8x128xf32>
    %c0_12 = arith.constant 0 : index
    %c0_13 = arith.constant 0 : index
    %19 = vector.load %arg10[%c0_12, %c0_13] : memref<8x128xf32, #tpu.memory_space<vmem>>, vector<8x128xf32>
    %20 = arith.mulf %19, %18 : vector<8x128xf32>
    %21 = arith.addf %14, %20 : vector<8x128xf32>
    %22 = arith.truncf %21 : vector<8x128xf32> to vector<8x128xbf16>
    %c0_14 = arith.constant 0 : index
    %c0_15 = arith.constant 0 : index
    %23 = vector.load %arg6[%c0_14, %c0_15] : memref<128x512xbf16, #tpu.memory_space<vmem>>, vector<128x512xbf16>
    %cst_16 = arith.constant dense<0.000000e+00> : vector<8x512xf32>
    %24 = tpu.matmul %22, %23, %cst_16 {dimension_numbers = #tpu.dot_dimension_numbers<[1], [0], [0], [1], [0, 0, 1, 1], [], []>} : vector<8x128xbf16>, vector<128x512xbf16>, vector<8x512xf32> -> vector<8x512xf32>
    %c0_17 = arith.constant 0 : index
    %c0_18 = arith.constant 0 : index
    %25 = vector.load %arg7[%c0_17, %c0_18] : memref<1x512xf32, #tpu.memory_space<vmem>>, vector<1x512xf32>
    %26 = vector.broadcast %25 : vector<1x512xf32> to vector<8x512xf32>
    %27 = arith.addf %24, %26 : vector<8x512xf32>
    %cst_19 = arith.constant 0.000000e+00 : f32
    %28 = vector.broadcast %cst_19 : f32 to vector<8x512xf32>
    %29 = arith.maximumf %27, %28 : vector<8x512xf32>
    %30 = arith.truncf %29 : vector<8x512xf32> to vector<8x512xbf16>
    %c0_20 = arith.constant 0 : index
    %c0_21 = arith.constant 0 : index
    %31 = vector.load %arg8[%c0_20, %c0_21] : memref<512x896xbf16, #tpu.memory_space<vmem>>, vector<512x896xbf16>
    %cst_22 = arith.constant dense<0.000000e+00> : vector<8x896xf32>
    %32 = tpu.matmul %30, %31, %cst_22 {dimension_numbers = #tpu.dot_dimension_numbers<[1], [0], [0], [1], [0, 0, 1, 1], [], []>} : vector<8x512xbf16>, vector<512x896xbf16>, vector<8x896xf32> -> vector<8x896xf32>
    %c0_23 = arith.constant 0 : index
    %c0_24 = arith.constant 0 : index
    %33 = vector.load %arg9[%c0_23, %c0_24] : memref<1x896xf32, #tpu.memory_space<vmem>>, vector<1x896xf32>
    %34 = vector.broadcast %33 : vector<1x896xf32> to vector<8x896xf32>
    %35 = arith.addf %32, %34 : vector<8x896xf32>
    %cst_25 = arith.constant 0.000000e+00 : f32
    %36 = vector.broadcast %cst_25 : f32 to vector<8x896xf32>
    %37 = arith.subf %36, %35 : vector<8x896xf32>
    %38 = math.exp %37 : vector<8x896xf32>
    %cst_26 = arith.constant 1.000000e+00 : f32
    %39 = vector.broadcast %cst_26 : f32 to vector<8x896xf32>
    %40 = arith.addf %39, %38 : vector<8x896xf32>
    %41 = tpu.reciprocal %40 {approx = true} : vector<8x896xf32> -> vector<8x896xf32>
    %c0_27 = arith.constant 0 : index
    %c0_28 = arith.constant 0 : index
    %42 = vector.load %arg11[%c0_27, %c0_28] : memref<8x896xf32, #tpu.memory_space<vmem>>, vector<8x896xf32>
    tpu.vector_store %arg11[%c0_27, %c0_28], %41 {strides = array<i32>} : memref<8x896xf32, #tpu.memory_space<vmem>>, vector<8x896xf32>,
    %c0_29 = arith.constant 0 : index
    %c0_30 = arith.constant 0 : index
    %43 = vector.load %arg12[%c0_29, %c0_30] : memref<8x128xf32, #tpu.memory_space<vmem>>, vector<8x128xf32>
    tpu.vector_store %arg12[%c0_29, %c0_30], %14 {strides = array<i32>} : memref<8x128xf32, #tpu.memory_space<vmem>>, vector<8x128xf32>,
    %c0_31 = arith.constant 0 : index
    %c0_32 = arith.constant 0 : index
    %44 = vector.load %arg13[%c0_31, %c0_32] : memref<8x128xf32, #tpu.memory_space<vmem>>, vector<8x128xf32>
    tpu.vector_store %arg13[%c0_31, %c0_32], %15 {strides = array<i32>} : memref<8x128xf32, #tpu.memory_space<vmem>>, vector<8x128xf32>,
    return
  }
  func.func @transform_0(%arg0: i32) -> (i32, i32) {
    %c0_i32 = arith.constant 0 : i32
    %c0_i32_0 = arith.constant 0 : i32
    return %arg0, %c0_i32 : i32, i32
  }
  func.func @transform_1(%arg0: i32) -> (i32, i32) {
    %c0_i32 = arith.constant 0 : i32
    %c0_i32_0 = arith.constant 0 : i32
    %c0_i32_1 = arith.constant 0 : i32
    return %c0_i32, %c0_i32_0 : i32, i32
  }
  func.func @transform_2(%arg0: i32) -> (i32, i32) {
    %c0_i32 = arith.constant 0 : i32
    %c0_i32_0 = arith.constant 0 : i32
    %c0_i32_1 = arith.constant 0 : i32
    return %c0_i32, %c0_i32_0 : i32, i32
  }
  func.func @transform_3(%arg0: i32) -> (i32, i32) {
    %c0_i32 = arith.constant 0 : i32
    %c0_i32_0 = arith.constant 0 : i32
    %c0_i32_1 = arith.constant 0 : i32
    return %c0_i32, %c0_i32_0 : i32, i32
  }
  func.func @transform_4(%arg0: i32) -> (i32, i32) {
    %c0_i32 = arith.constant 0 : i32
    %c0_i32_0 = arith.constant 0 : i32
    %c0_i32_1 = arith.constant 0 : i32
    return %c0_i32, %c0_i32_0 : i32, i32
  }
  func.func @transform_5(%arg0: i32) -> (i32, i32) {
    %c0_i32 = arith.constant 0 : i32
    %c0_i32_0 = arith.constant 0 : i32
    %c0_i32_1 = arith.constant 0 : i32
    return %c0_i32, %c0_i32_0 : i32, i32
  }
  func.func @transform_6(%arg0: i32) -> (i32, i32) {
    %c0_i32 = arith.constant 0 : i32
    %c0_i32_0 = arith.constant 0 : i32
    %c0_i32_1 = arith.constant 0 : i32
    return %c0_i32, %c0_i32_0 : i32, i32
  }
  func.func @transform_7(%arg0: i32) -> (i32, i32) {
    %c0_i32 = arith.constant 0 : i32
    %c0_i32_0 = arith.constant 0 : i32
    %c0_i32_1 = arith.constant 0 : i32
    return %c0_i32, %c0_i32_0 : i32, i32
  }
  func.func @transform_8(%arg0: i32) -> (i32, i32) {
    %c0_i32 = arith.constant 0 : i32
    %c0_i32_0 = arith.constant 0 : i32
    %c0_i32_1 = arith.constant 0 : i32
    return %c0_i32, %c0_i32_0 : i32, i32
  }
  func.func @transform_9(%arg0: i32) -> (i32, i32) {
    %c0_i32 = arith.constant 0 : i32
    %c0_i32_0 = arith.constant 0 : i32
    return %arg0, %c0_i32 : i32, i32
  }
  func.func @transform_10(%arg0: i32) -> (i32, i32) {
    %c0_i32 = arith.constant 0 : i32
    %c0_i32_0 = arith.constant 0 : i32
    return %arg0, %c0_i32 : i32, i32
  }
  func.func @transform_11(%arg0: i32) -> (i32, i32) {
    %c0_i32 = arith.constant 0 : i32
    %c0_i32_0 = arith.constant 0 : i32
    return %arg0, %c0_i32 : i32, i32
  }
  func.func @transform_12(%arg0: i32) -> (i32, i32) {
    %c0_i32 = arith.constant 0 : i32
    %c0_i32_0 = arith.constant 0 : i32
    return %arg0, %c0_i32 : i32, i32
  }
}

</mosaic_0001>

<bundles_post_ra>
// kernel: tpu_custom_call.1
= control target key start
LH: loop header
LB: loop body
LE: loop exit
PB: predicated region body
PF: predicated region fallthrough
CT: control target
= control target key end

     0   :  { %18 = vsyncpa [#allocation3], 0  ;;  %s6446_s0 = inlined_call_operand.hbm [shape: bf16[8,896], index: 0, kind: input, shape index: {}]   ;;  %s6447_s1 = inlined_call_operand.hbm [shape: bf16[896,512], index: 1, kind: input, shape index: {}]   ;;  %s6448_s2 = inlined_call_operand.hbm [shape: f32[1,512], index: 2, kind: input, shape index: {}]   ;;  %s6449_s3 = inlined_call_operand.hbm [shape: bf16[512,256], index: 3, kind: input, shape index: {}]   ;;  %s6450_s4 = inlined_call_operand.hbm [shape: f32[1,256], index: 4, kind: input, shape index: {}]   ;;  %s6451_s5 = inlined_call_operand.hbm [shape: bf16[128,512], index: 5, kind: input, shape index: {}]   ;;  %s6452_s6 = inlined_call_operand.hbm [shape: f32[1,512], index: 6, kind: input, shape index: {}]   ;;  %s6453_s7 = inlined_call_operand.hbm [shape: bf16[512,896], index: 7, kind: input, shape index: {}]   ;;  %s6454_s8 = inlined_call_operand.vmem [shape: f32[1,896], index: 8, kind: input, shape index: {}]   ;;  %s6455_s9 = inlined_call_operand.vmem [shape: f32[8,128], index: 9, kind: input, shape index: {}]   ;;  %s6456_s10 = inlined_call_operand.hbm [shape: f32[8,896], index: 10, kind: output, shape index: {0}]   ;;  %s6457_s11 = inlined_call_operand.hbm [shape: f32[8,128], index: 11, kind: output, shape index: {1}]   ;;  %s6458_s12 = inlined_call_operand.hbm [shape: f32[8,128], index: 12, kind: output, shape index: {2}]  }
   0x1   :  { %19 = vsyncpa [#allocation6], 0 }
   0x2   :  { %20 = vsyncpa [#allocation9], 0 }
   0x3   :  { %21 = vsyncpa [#allocation12], 0 }
   0x4   :  { %22 = vsyncpa [#allocation15], 0 }
   0x5   :  { %23 = vsyncpa [#allocation4], 0 }
   0x6   :  { %24 = vsyncpa [#allocation18], 0  ;;  %s6208_s21 = smov [#allocation5]  }
   0x7   :  { %s40_s22 = sshll.u32 %s6208_s21, 4  ;;  %s41_s22 = int_to_ptr.vmem [resolvable:$true] %s40_s22 }
   0x8   :  { %s5982_s23 = scalar_lea.vmem %s41_s22, 28672  ;;  %p5987_p1 = scmp.lt.s32.totalorder %s41_s22, %s41_s22 }
   0x9   :  { %p5983_p0 = scmp.ne.s32.totalorder %s41_s22, %s5982_s23  ;;  %p5988_p2 = scmp.lt.s32.totalorder %s5982_s23, %s5982_s23 }
   0xb   :  { %p5989_p3 = por %p5988_p2, %p5987_p1 }
   0xd   :  { %p5990_p4 = pnand %p5989_p3, %p5983_p0 }
   0xf   :  { %5993 = shalt.err (!%p5990_p4)
}
  0x10   :  { %s6209_s24 = smov 256   ;;  %s6210_s25 = smov 16  }
  0x11   :  { %46 = dma.hbm_to_vmem [thread:$0]  %s6447_s1, 28672, %s41_s22, [#allocation6], %s6209_s24, %s6209_s24, %s6210_s25  }
  0x12   :  { %s6211_s28 = smov [#allocation8]  }
  0x13   :  { %s62_s29 = sshll.u32 %s6211_s28, 4  ;;  %s63_s29 = int_to_ptr.vmem [resolvable:$true] %s62_s29 }
  0x14   :  { %s6002_s30 = scalar_lea.vmem %s63_s29, 8192  ;;  %p6007_p6 = scmp.lt.s32.totalorder %s63_s29, %s63_s29 }
  0x15   :  { %p6003_p5 = scmp.ne.s32.totalorder %s63_s29, %s6002_s30  ;;  %p6008_p7 = scmp.lt.s32.totalorder %s6002_s30, %s6002_s30 }
  0x17   :  { %p6009_p8 = por %p6008_p7, %p6007_p6 }
  0x19   :  { %p6010_p9 = pnand %p6009_p8, %p6003_p5 }
  0x1b   :  { %6013 = shalt.err (!%p6010_p9)
}
  0x1c   :  { %s6212_s13 = smov 128   ;;  %s6213_s14 = smov 8  }
  0x1d   :  { %68 = dma.hbm_to_vmem [thread:$0]  %s6449_s3, 8192, %s63_s29, [#allocation9], %s6212_s13, %s6212_s13, %s6213_s14  }
  0x1e   :  { %s6214_s17 = smov [#allocation11]   ;;  %s6215_s19 = smov [#allocation2]  }
  0x1f   :  { %s84_s18 = sshll.u32 %s6214_s17, 4  ;;  %s31_s1 = sshll.u32 %s6215_s19, 4  ;;  %s85_s18 = int_to_ptr.vmem [resolvable:$true] %s84_s18  ;;  %s32_s1 = int_to_ptr.vmem [resolvable:$true] %s31_s1 }
  0x20   :  { %s6022_s20 = scalar_lea.vmem %s85_s18, 4096  ;;  %p6027_p11 = scmp.lt.s32.totalorder %s85_s18, %s85_s18 }
  0x21   :  { %p6023_p10 = scmp.ne.s32.totalorder %s85_s18, %s6022_s20  ;;  %p6028_p12 = scmp.lt.s32.totalorder %s6022_s20, %s6022_s20 }
  0x23   :  { %p6029_p13 = por %p6028_p12, %p6027_p11 }
  0x25   :  { %p6030_p0 = pnand %p6029_p13, %p6023_p10 }
  0x27   :  { %6033 = shalt.err (!%p6030_p0)
}
  0x28   :  { %90 = dma.hbm_to_vmem [thread:$0]  %s6451_s5, 4096, %s85_s18, [#allocation12], %s6209_s24, %s6209_s24, %s6210_s25  }
  0x29   :  { %s6042_s3 = scalar_lea.vmem %s32_s1, 448  ;;  %p6047_p2 = scmp.lt.s32.totalorder %s32_s1, %s32_s1 }
  0x2a   :  { %p6043_p1 = scmp.ne.s32.totalorder %s32_s1, %s6042_s3  ;;  %p6048_p3 = scmp.lt.s32.totalorder %s6042_s3, %s6042_s3 }
  0x2c   :  { %p6049_p4 = por %p6048_p3, %p6047_p2 }
  0x2e   :  { %p6050_p5 = pnand %p6049_p4, %p6043_p1 }
  0x30   :  { %6053 = shalt.err (!%p6050_p5)
}
  0x31   :  { %34 = dma.hbm_to_vmem [thread:$0]  %s6446_s0, 448, %s32_s1, [#allocation3]  }
  0x32   :  { %s6216_s27 = smov [#allocation7]   ;;  %s6217_s29 = smov [#allocation10]  }
  0x33   :  { %s53_s28 = sshll.u32 %s6216_s27, 4  ;;  %s75_s30 = sshll.u32 %s6217_s29, 4  ;;  %s54_s28 = int_to_ptr.vmem [resolvable:$true] %s53_s28  ;;  %s76_s30 = int_to_ptr.vmem [resolvable:$true] %s75_s30 }
  0x34   :  { %s6062_s13 = scalar_lea.vmem %s54_s28, 64  ;;  %p6067_p7 = scmp.lt.s32.totalorder %s54_s28, %s54_s28 }
  0x35   :  { %p6063_p6 = scmp.ne.s32.totalorder %s54_s28, %s6062_s13  ;;  %p6068_p8 = scmp.lt.s32.totalorder %s6062_s13, %s6062_s13 }
  0x37   :  { %p6069_p9 = por %p6068_p8, %p6067_p7 }
  0x39   :  { %p6070_p10 = pnand %p6069_p9, %p6063_p6 }
  0x3b   :  { %6073 = shalt.err (!%p6070_p10)
}
  0x3c   :  { %56 = dma.hbm_to_vmem [thread:$0]  %s6448_s2, 64, %s54_s28, [#allocation6]  }
  0x3d   :  { %s6082_s25 = scalar_lea.vmem %s76_s30, 32  ;;  %p6087_p12 = scmp.lt.s32.totalorder %s76_s30, %s76_s30 }
  0x3e   :  { %p6083_p11 = scmp.ne.s32.totalorder %s76_s30, %s6082_s25  ;;  %p6088_p13 = scmp.lt.s32.totalorder %s6082_s25, %s6082_s25 }
  0x40   :  { %p6089_p0 = por %p6088_p13, %p6087_p12 }
  0x42   :  { %p6090_p1 = pnand %p6089_p0, %p6083_p11 }
  0x44   :  { %6093 = shalt.err (!%p6090_p1)
}
  0x45   :  { %78 = dma.hbm_to_vmem [thread:$0]  %s6450_s4, 32, %s76_s30, [#allocation9]  }
  0x46   :  { %s6218_s15 = smov [#allocation13]   ;;  %s6219_s17 = smov [#allocation14]  }
  0x47   :  { %s97_s16 = sshll.u32 %s6218_s15, 4  ;;  %s106_s18 = sshll.u32 %s6219_s17, 4  ;;  %s98_s16 = int_to_ptr.vmem [resolvable:$true] %s97_s16  ;;  %s107_s18 = int_to_ptr.vmem [resolvable:$true] %s106_s18 }
  0x48   :  { %s6102_s19 = scalar_lea.vmem %s98_s16, 64  ;;  %p6107_p3 = scmp.lt.s32.totalorder %s98_s16, %s98_s16 }
  0x49   :  { %p6103_p2 = scmp.ne.s32.totalorder %s98_s16, %s6102_s19  ;;  %p6108_p4 = scmp.lt.s32.totalorder %s6102_s19, %s6102_s19 }
  0x4b   :  { %p6109_p5 = por %p6108_p4, %p6107_p3 }
  0x4d   :  { %p6110_p6 = pnand %p6109_p5, %p6103_p2 }
  0x4f   :  { %6113 = shalt.err (!%p6110_p6)
}
  0x50   :  { %100 = dma.hbm_to_vmem [thread:$0]  %s6452_s6, 64, %s98_s16, [#allocation12]  }
  0x51   :  { %s6122_s20 = scalar_lea.vmem %s107_s18, 28672  ;;  %p6127_p8 = scmp.lt.s32.totalorder %s107_s18, %s107_s18 }
  0x52   :  { %p6123_p7 = scmp.ne.s32.totalorder %s107_s18, %s6122_s20  ;;  %p6128_p9 = scmp.lt.s32.totalorder %s6122_s20, %s6122_s20 }
  0x54   :  { %p6129_p10 = por %p6128_p9, %p6127_p8 }
  0x56   :  { %p6130_p11 = pnand %p6129_p10, %p6123_p7 }
  0x58   :  { %6133 = shalt.err (!%p6130_p11)
}
  0x59   :  { %s6220_s4 = smov 448   ;;  %s6221_s21 = smov 28  }
  0x5a   :  { %112 = dma.hbm_to_vmem [thread:$0]  %s6453_s7, 28672, %s107_s18, [#allocation15], %s6220_s4, %s6220_s4, %s6221_s21  }
  0x5b   :  { %6194 = dma.done.wait [#allocation3], 448  }
  0x5c   :  { %6195 = vsyncadd [#allocation3], 4294966848 }
  0x5d   :  { %6196 = dma.done.wait [#allocation6], 28736  }
  0x5e   :  { %6197 = vsyncadd [#allocation6], 4294938560 }
  0x5f   :  { %6198 = dma.done.wait [#allocation9], 8224  }
  0x60   :  { %6199 = vsyncadd [#allocation9], 4294959072 }
  0x61   :  { %6200 = dma.done.wait [#allocation12], 4160  }
  0x62   :  { %6201 = vsyncadd [#allocation12], 4294963136 }
  0x63   :  { %6202 = dma.done.wait [#allocation15], 28672  }
  0x64   :  { %6203 = vsyncadd [#allocation15], 4294938624  ;;  %v5136_v0 = vld [vmem:[#allocation5 + $0xe4] ss:$16 sps:$4 sm:$0xff]   ;;  %v5140_v2 = vld [vmem:[#allocation5 + $0xe0] ss:$16 sps:$4 sm:$0xff]  }
  0x65   :  { %v5138_v1 = vld [vmem:[#allocation5 + $0x2e4] ss:$16 sps:$4 sm:$0xff]   ;;  %1537 = vmatprep.subr.bf16.mxu0 %v5136_v0  ;;  %v5141_v3 = vld [vmem:[#allocation5 + $0x2e0] ss:$16 sps:$4 sm:$0xff]  }
  0x66   :  { %1578 = vmatprep.subr.bf16.mxu1 %v5138_v1  ;;  %v5142_v4 = vld [vmem:[#allocation5 + $0xc4] ss:$16 sps:$4 sm:$0xff]   ;;  %1538 = vmatpush1.bf16.msra.mxu0 %v5140_v2  ;;  %v5146_v6 = vld [vmem:[#allocation5 + $0xc0] ss:$16 sps:$4 sm:$0xff]  }
  0x67   :  { %1579 = vmatpush1.bf16.msra.mxu1 %v5141_v3  ;;  %v5144_v5 = vld [vmem:[#allocation5 + $0x2c4] ss:$16 sps:$4 sm:$0xff]   ;;  %1539 = vmatprep.subr.bf16.mxu0 %v5142_v4  ;;  %v5147_v7 = vld [vmem:[#allocation5 + $0x2c0] ss:$16 sps:$4 sm:$0xff]  }
  0x68   :  { %1580 = vmatprep.subr.bf16.mxu1 %v5144_v5  ;;  %v5148_v8 = vld [vmem:[#allocation5 + $0xa4] ss:$16 sps:$4 sm:$0xff]   ;;  %v5152_v10 = vld [vmem:[#allocation5 + $0xa0] ss:$16 sps:$4 sm:$0xff]  }
  0x69   :  { %v5150_v9 = vld [vmem:[#allocation5 + $0x2a4] ss:$16 sps:$4 sm:$0xff]   ;;  %v5153_v11 = vld [vmem:[#allocation5 + $0x2a0] ss:$16 sps:$4 sm:$0xff]  }
  0x6a   :  { %1540 = vmatpush1.bf16.msra.mxu0 %v5146_v6  ;;  %v5154_v12 = vld [vmem:[#allocation5 + $0x84] ss:$16 sps:$4 sm:$0xff]   ;;  %v5158_v14 = vld [vmem:[#allocation5 + $0x80] ss:$16 sps:$4 sm:$0xff]  }
  0x6b   :  { %1581 = vmatpush1.bf16.msra.mxu1 %v5147_v7  ;;  %1541 = vmatprep.subr.bf16.mxu0 %v5148_v8  ;;  %v5156_v13 = vld [vmem:[#allocation5 + $0x284] ss:$16 sps:$4 sm:$0xff]   ;;  %v5159_v15 = vld [vmem:[#allocation5 + $0x280] ss:$16 sps:$4 sm:$0xff]  }
  0x6c   :  { %1582 = vmatprep.subr.bf16.mxu1 %v5150_v9  ;;  %v5160_v16 = vld [vmem:[#allocation5 + $0x64] ss:$16 sps:$4 sm:$0xff]   ;;  %v5164_v18 = vld [vmem:[#allocation5 + $0x60] ss:$16 sps:$4 sm:$0xff]  }
  0x6d   :  { %v5162_v17 = vld [vmem:[#allocation5 + $0x264] ss:$16 sps:$4 sm:$0xff]   ;;  %v5165_v19 = vld [vmem:[#allocation5 + $0x260] ss:$16 sps:$4 sm:$0xff]  }
  0x6e   :  { %1542 = vmatpush1.bf16.msra.mxu0 %v5152_v10  ;;  %v5166_v20 = vld [vmem:[#allocation5 + $0x44] ss:$16 sps:$4 sm:$0xff]   ;;  %v5170_v22 = vld [vmem:[#allocation5 + $0x40] ss:$16 sps:$4 sm:$0xff]  }
  0x6f   :  { %1583 = vmatpush1.bf16.msra.mxu1 %v5153_v11  ;;  %1543 = vmatprep.subr.bf16.mxu0 %v5154_v12  ;;  %v5168_v21 = vld [vmem:[#allocation5 + $0x244] ss:$16 sps:$4 sm:$0xff]   ;;  %v5171_v23 = vld [vmem:[#allocation5 + $0x240] ss:$16 sps:$4 sm:$0xff]  }
  0x70   :  { %1584 = vmatprep.subr.bf16.mxu1 %v5156_v13  ;;  %v5172_v24 = vld [vmem:[#allocation5 + $0x24] ss:$16 sps:$4 sm:$0xff]   ;;  %v5176_v26 = vld [vmem:[#allocation5 + $0x20] ss:$16 sps:$4 sm:$0xff]  }
  0x71   :  { %v5174_v25 = vld [vmem:[#allocation5 + $0x224] ss:$16 sps:$4 sm:$0xff]   ;;  %v5177_v27 = vld [vmem:[#allocation5 + $0x220] ss:$16 sps:$4 sm:$0xff]  }
  0x72   :  { %1544 = vmatpush1.bf16.msra.mxu0 %v5158_v14  ;;  %v5178_v28 = vld [vmem:[#allocation5 + $0x4] ss:$16 sps:$4 sm:$0xff]   ;;  %v5182_v30 = vld [vmem:[#allocation5] ss:$16 sps:$4 sm:$0xff]  }
  0x73   :  { %1585 = vmatpush1.bf16.msra.mxu1 %v5159_v15  ;;  %1545 = vmatprep.subr.bf16.mxu0 %v5160_v16  ;;  %v5180_v29 = vld [vmem:[#allocation5 + $0x204] ss:$16 sps:$4 sm:$0xff]   ;;  %v5183_v31 = vld [vmem:[#allocation5 + $0x200] ss:$16 sps:$4 sm:$0xff]   ;;  %v6222_v16 = vmov 0  }
  0x74   :  { %1586 = vmatprep.subr.bf16.mxu1 %v5162_v17  ;;  %v5184_v32 = vld [vmem:[#allocation5 + $0x1e4] ss:$16 sps:$4 sm:$0xff]   ;;  %v5188_v34 = vld [vmem:[#allocation5 + $0x1e0] ss:$16 sps:$4 sm:$0xff]  }
  0x75   :  { %v5186_v33 = vld [vmem:[#allocation5 + $0x3e4] ss:$16 sps:$4 sm:$0xff]   ;;  %v5189_v35 = vld [vmem:[#allocation5 + $0x3e0] ss:$16 sps:$4 sm:$0xff]  }
  0x76   :  { %1546 = vmatpush1.bf16.msra.mxu0 %v5164_v18  ;;  %v5190_v36 = vld [vmem:[#allocation5 + $0x1c4] ss:$16 sps:$4 sm:$0xff]   ;;  %v5194_v38 = vld [vmem:[#allocation5 + $0x1c0] ss:$16 sps:$4 sm:$0xff]  }
  0x77   :  { %1587 = vmatpush1.bf16.msra.mxu1 %v5165_v19  ;;  %1547 = vmatprep.subr.bf16.mxu0 %v5166_v20  ;;  %v5192_v37 = vld [vmem:[#allocation5 + $0x3c4] ss:$16 sps:$4 sm:$0xff]   ;;  %v5195_v39 = vld [vmem:[#allocation5 + $0x3c0] ss:$16 sps:$4 sm:$0xff]  }
  0x78   :  { %1588 = vmatprep.subr.bf16.mxu1 %v5168_v21  ;;  %v5196_v40 = vld [vmem:[#allocation5 + $0x1a4] ss:$16 sps:$4 sm:$0xff]   ;;  %v5200_v42 = vld [vmem:[#allocation5 + $0x1a0] ss:$16 sps:$4 sm:$0xff]  }
  0x79   :  { %v5198_v41 = vld [vmem:[#allocation5 + $0x3a4] ss:$16 sps:$4 sm:$0xff]   ;;  %v5201_v43 = vld [vmem:[#allocation5 + $0x3a0] ss:$16 sps:$4 sm:$0xff]  }
  0x7a   :  { %1548 = vmatpush1.bf16.msra.mxu0 %v5170_v22  ;;  %v5202_v44 = vld [vmem:[#allocation5 + $0x184] ss:$16 sps:$4 sm:$0xff]   ;;  %v143_v48 = vld [vmem:[#allocation2 + $0x8] sm:$0xff] }
  0x7b   :  { %1589 = vmatpush1.bf16.msra.mxu1 %v5171_v23  ;;  %1549 = vmatprep.subr.bf16.mxu0 %v5172_v24  ;;  %v5204_v45 = vld [vmem:[#allocation5 + $0x384] ss:$16 sps:$4 sm:$0xff]   ;;  %v5206_v49 = vld [vmem:[#allocation5 + $0x180] ss:$16 sps:$4 sm:$0xff]   ;;  %v6323_v51 = vcombine.high %v143_v48, %v143_v48  ;;  %v6329_v7 = vcombine.low %v143_v48, %v143_v48  ;;  %v5296_v48 = vld [vmem:[#allocation5 + $0xcc] ss:$16 sps:$4 sm:$0xff]  }
  0x7c   :  { %1590 = vmatprep.subr.bf16.mxu1 %v5174_v25  ;;  %v142_v46 = vld [vmem:[#allocation2] sm:$0xff]  ;;  %v5207_v50 = vld [vmem:[#allocation5 + $0x380] ss:$16 sps:$4 sm:$0xff]  }
  0x7d   :  { %v6321_v47 = vcombine.high %v142_v46, %v142_v46  ;;  %v5208_v52 = vld [vmem:[#allocation5 + $0x164] ss:$16 sps:$4 sm:$0xff]   ;;  %1610 = vmatprep.mubr.bf16.mxu1 %v6323_v51  ;;  %v5212_v54 = vld [vmem:[#allocation5 + $0x160] ss:$16 sps:$4 sm:$0xff]   ;;  %v6327_v6 = vcombine.low %v142_v46, %v142_v46 }
  0x7e   :  { %1550 = vmatpush1.bf16.msra.mxu0 %v5176_v26  ;;  %v5210_v53 = vld [vmem:[#allocation5 + $0x364] ss:$16 sps:$4 sm:$0xff]   ;;  %v5213_v55 = vld [vmem:[#allocation5 + $0x360] ss:$16 sps:$4 sm:$0xff]  }
  0x7f   :  { %1591 = vmatpush1.bf16.msra.mxu1 %v5177_v27  ;;  %1551 = vmatprep.subr.bf16.mxu0 %v5178_v28  ;;  %v5214_v56 = vld [vmem:[#allocation5 + $0x144] ss:$16 sps:$4 sm:$0xff]   ;;  %v5218_v58 = vld [vmem:[#allocation5 + $0x140] ss:$16 sps:$4 sm:$0xff]  }
  0x80   :  { %1592 = vmatprep.subr.bf16.mxu1 %v5180_v29  ;;  %1569 = vmatprep.mubr.bf16.mxu0 %v6321_v47  ;;  %v5216_v57 = vld [vmem:[#allocation5 + $0x344] ss:$16 sps:$4 sm:$0xff]   ;;  %v5219_v59 = vld [vmem:[#allocation5 + $0x340] ss:$16 sps:$4 sm:$0xff]  }
  0x81   :  { %v5220_v60 = vld [vmem:[#allocation5 + $0x124] ss:$16 sps:$4 sm:$0xff]   ;;  %v5224_v62 = vld [vmem:[#allocation5 + $0x120] ss:$16 sps:$4 sm:$0xff]  }
  0x82   :  { %1552 = vmatpush1.bf16.msra.mxu0 %v5182_v30  ;;  %v5222_v61 = vld [vmem:[#allocation5 + $0x324] ss:$16 sps:$4 sm:$0xff]   ;;  %v5225_v63 = vld [vmem:[#allocation5 + $0x320] ss:$16 sps:$4 sm:$0xff]  }
  0x83   :  { %1593 = vmatpush1.bf16.msra.mxu1 %v5183_v31  ;;  %1553 = vmatprep.subr.bf16.mxu0 %v5184_v32  ;;  %v5226_v0 = vld [vmem:[#allocation5 + $0x104] ss:$16 sps:$4 sm:$0xff]   ;;  %v5230_v2 = vld [vmem:[#allocation5 + $0x100] ss:$16 sps:$4 sm:$0xff]  }
  0x84   :  { %1594 = vmatprep.subr.bf16.mxu1 %v5186_v33  ;;  %v5228_v1 = vld [vmem:[#allocation5 + $0x304] ss:$16 sps:$4 sm:$0xff]   ;;  %v5231_v3 = vld [vmem:[#allocation5 + $0x300] ss:$16 sps:$4 sm:$0xff]  }
  0x85   :  { %v5238_v4 = vld [vmem:[#allocation5 + $0x4e4] ss:$16 sps:$4 sm:$0xff]   ;;  %v5236_v8 = vld [vmem:[#allocation5 + $0x4e0] ss:$16 sps:$4 sm:$0xff]  }
  0x86   :  { %1554 = vmatpush2.bf16.msra.mxu0 %v5188_v34  ;;  %v5241_v5 = vld [vmem:[#allocation5 + $0x6e4] ss:$16 sps:$4 sm:$0xff]   ;;  %v5239_v9 = vld [vmem:[#allocation5 + $0x6e0] ss:$16 sps:$4 sm:$0xff]  }
  0x87   :  { %1595 = vmatpush2.bf16.msra.mxu1 %v5189_v35  ;;  %1555 = vmatprep.subr.bf16.mxu0 %v5190_v36  ;;  %v5244_v10 = vld [vmem:[#allocation5 + $0x4c4] ss:$16 sps:$4 sm:$0xff]   ;;  %v5242_v12 = vld [vmem:[#allocation5 + $0x4c0] ss:$16 sps:$4 sm:$0xff]  }
  0x88   :  { %1596 = vmatprep.subr.bf16.mxu1 %v5192_v37  ;;  %v5247_v11 = vld [vmem:[#allocation5 + $0x6c4] ss:$16 sps:$4 sm:$0xff]   ;;  %v5245_v13 = vld [vmem:[#allocation5 + $0x6c0] ss:$16 sps:$4 sm:$0xff]  }
  0x89   :  { %v5250_v14 = vld [vmem:[#allocation5 + $0x4a4] ss:$16 sps:$4 sm:$0xff]   ;;  %v5248_v17 = vld [vmem:[#allocation5 + $0x4a0] ss:$16 sps:$4 sm:$0xff]  }
  0x8a   :  { %1556 = vmatpush2.bf16.msra.mxu0 %v5194_v38  ;;  %v5253_v15 = vld [vmem:[#allocation5 + $0x6a4] ss:$16 sps:$4 sm:$0xff]   ;;  %v5251_v18 = vld [vmem:[#allocation5 + $0x6a0] ss:$16 sps:$4 sm:$0xff]  }
  0x8b   :  { %1597 = vmatpush2.bf16.msra.mxu1 %v5195_v39  ;;  %1557 = vmatprep.subr.bf16.mxu0 %v5196_v40  ;;  %v5256_v19 = vld [vmem:[#allocation5 + $0x484] ss:$16 sps:$4 sm:$0xff]   ;;  %v5254_v21 = vld [vmem:[#allocation5 + $0x480] ss:$16 sps:$4 sm:$0xff]  }
  0x8c   :  { %1598 = vmatprep.subr.bf16.mxu1 %v5198_v41  ;;  %v5259_v20 = vld [vmem:[#allocation5 + $0x684] ss:$16 sps:$4 sm:$0xff]   ;;  %v5257_v22 = vld [vmem:[#allocation5 + $0x680] ss:$16 sps:$4 sm:$0xff]  }
  0x8d   :  { %v5262_v23 = vld [vmem:[#allocation5 + $0x464] ss:$16 sps:$4 sm:$0xff]   ;;  %v5260_v25 = vld [vmem:[#allocation5 + $0x460] ss:$16 sps:$4 sm:$0xff]  }
  0x8e   :  { %1558 = vmatpush2.bf16.msra.mxu0 %v5200_v42  ;;  %v5265_v24 = vld [vmem:[#allocation5 + $0x664] ss:$16 sps:$4 sm:$0xff]   ;;  %v5263_v26 = vld [vmem:[#allocation5 + $0x660] ss:$16 sps:$4 sm:$0xff]   ;;  %v5290_v42 = vld [vmem:[#allocation5 + $0xec] ss:$16 sps:$4 sm:$0xff]  }
  0x8f   :  { %1599 = vmatpush2.bf16.msra.mxu1 %v5201_v43  ;;  %1559 = vmatprep.subr.bf16.mxu0 %v5202_v44  ;;  %v5268_v27 = vld [vmem:[#allocation5 + $0x444] ss:$16 sps:$4 sm:$0xff]   ;;  %v5266_v29 = vld [vmem:[#allocation5 + $0x440] ss:$16 sps:$4 sm:$0xff]   ;;  %v5287_v44 = vld [vmem:[#allocation2 + $0x18] ss:$0 sps:$4 sm:$0xff]  }
  0x90   :  { %1600 = vmatprep.subr.bf16.mxu1 %v5204_v45  ;;  %v5271_v28 = vld [vmem:[#allocation5 + $0x644] ss:$16 sps:$4 sm:$0xff]   ;;  %v5269_v30 = vld [vmem:[#allocation5 + $0x640] ss:$16 sps:$4 sm:$0xff]   ;;  %v5288_v45 = vld [vmem:[#allocation5 + $0xe8] ss:$16 sps:$4 sm:$0xff]  }
  0x91   :  { %v5274_v31 = vld [vmem:[#allocation5 + $0x424] ss:$16 sps:$4 sm:$0xff]   ;;  %v5272_v34 = vld [vmem:[#allocation5 + $0x420] ss:$16 sps:$4 sm:$0xff]  }
  0x92   :  { %1560 = vmatpush2.bf16.msra.mxu0 %v5206_v49  ;;  %v5277_v32 = vld [vmem:[#allocation5 + $0x624] ss:$16 sps:$4 sm:$0xff]   ;;  %v5275_v36 = vld [vmem:[#allocation5 + $0x620] ss:$16 sps:$4 sm:$0xff]  }
  0x93   :  { %1601 = vmatpush2.bf16.msra.mxu1 %v5207_v50  ;;  %1561 = vmatprep.subr.bf16.mxu0 %v5208_v52  ;;  %v6334_v33 = vld [vmem:[#allocation2 + $0x10] sm:$0xff]  ;;  %v5278_v39 = vld [vmem:[#allocation5 + $0x400] ss:$16 sps:$4 sm:$0xff]  }
  0x94   :  { %1602 = vmatprep.subr.bf16.mxu1 %v5210_v53  ;;  %v6338_v35 = vcombine.high %v6334_v33, %v6334_v33  ;;  %v5280_v37 = vld [vmem:[#allocation5 + $0x404] ss:$16 sps:$4 sm:$0xff]   ;;  %v5281_v40 = vld [vmem:[#allocation5 + $0x600] ss:$16 sps:$4 sm:$0xff]   ;;  %v5294_v50 = vld [vmem:[#allocation5 + $0xc8] ss:$16 sps:$4 sm:$0xff]  }
  0x95   :  { %v5283_v38 = vld [vmem:[#allocation5 + $0x604] ss:$16 sps:$4 sm:$0xff]   ;;  %v5284_v43 = vld [vmem:[#allocation5 + $0x5e0] ss:$16 sps:$4 sm:$0xff]   ;;  %v5302_v53 = vld [vmem:[#allocation5 + $0xac] ss:$16 sps:$4 sm:$0xff]  }
  0x96   :  { %1562 = vmatpush2.bf16.msra.mxu0 %v5212_v54  ;;  %v5286_v41 = vld [vmem:[#allocation5 + $0x5e4] ss:$16 sps:$4 sm:$0xff]   ;;  %v5291_v49 = vld [vmem:[#allocation5 + $0x5c0] ss:$16 sps:$4 sm:$0xff]  }
  0x97   :  { %1603 = vmatpush2.bf16.msra.mxu1 %v5213_v55  ;;  %1563 = vmatprep.subr.bf16.mxu0 %v5214_v56  ;;  %v5293_v46 = vld [vmem:[#allocation5 + $0x5c4] ss:$16 sps:$4 sm:$0xff]   ;;  %v5297_v54 = vld [vmem:[#allocation5 + $0x5a0] ss:$16 sps:$4 sm:$0xff]   ;;  %v5300_v55 = vld [vmem:[#allocation5 + $0xa8] ss:$16 sps:$4 sm:$0xff]  }
  0x98   :  { %1604 = vmatprep.subr.bf16.mxu1 %v5216_v57  ;;  %v5299_v52 = vld [vmem:[#allocation5 + $0x5a4] ss:$16 sps:$4 sm:$0xff]   ;;  %v5308_v57 = vld [vmem:[#allocation5 + $0x8c] ss:$16 sps:$4 sm:$0xff]  }
  0x99   :  { %v5305_v56 = vld [vmem:[#allocation5 + $0x584] ss:$16 sps:$4 sm:$0xff]  }
  0x9a   :  { %1564 = vmatpush2.bf16.msra.mxu0 %v5218_v58  ;;  %v5303_v58 = vld [vmem:[#allocation5 + $0x580] ss:$16 sps:$4 sm:$0xff]  }
  0x9b   :  { %1605 = vmatpush2.bf16.msra.mxu1 %v5219_v59  ;;  %1565 = vmatprep.subr.bf16.mxu0 %v5220_v60  ;;  %v5306_v59 = vld [vmem:[#allocation5 + $0x88] ss:$16 sps:$4 sm:$0xff]   ;;  %v5311_v60 = vld [vmem:[#allocation5 + $0x564] ss:$16 sps:$4 sm:$0xff]  }
  0x9c   :  { %1606 = vmatprep.subr.bf16.mxu1 %v5222_v61  ;;  %v5314_v61 = vld [vmem:[#allocation5 + $0x6c] ss:$16 sps:$4 sm:$0xff]  }
  0x9e   :  { %1566 = vmatpush2.bf16.msra.mxu0 %v5224_v62  ;;  %v5309_v62 = vld [vmem:[#allocation5 + $0x560] ss:$16 sps:$4 sm:$0xff]  }
  0x9f   :  { %1607 = vmatpush2.bf16.msra.mxu1 %v5225_v63  ;;  %1567 = vmatprep.subr.bf16.mxu0 %v5226_v0  ;;  %v5317_v63 = vld [vmem:[#allocation5 + $0x544] ss:$16 sps:$4 sm:$0xff]   ;;  %v5320_v0 = vld [vmem:[#allocation5 + $0x4c] ss:$16 sps:$4 sm:$0xff]  }
  0xa0   :  { %1608 = vmatprep.subr.bf16.mxu1 %v5228_v1  ;;  %v5315_v1 = vld [vmem:[#allocation5 + $0x540] ss:$16 sps:$4 sm:$0xff]  }
  0xa2   :  { %1568 = vmatpush2.bf16.msra.mxu0 %v5230_v2  ;;  %v5318_v2 = vld [vmem:[#allocation5 + $0x48] ss:$16 sps:$4 sm:$0xff]  }
  0xa3   :  { %1609 = vmatpush2.bf16.msra.mxu1 %v5231_v3  ;;  %1619 = vmatprep.subr.bf16.mxu0 %v5238_v4  ;;  %v5323_v3 = vld [vmem:[#allocation5 + $0x524] ss:$16 sps:$4 sm:$0xff]   ;;  %v5326_v4 = vld [vmem:[#allocation5 + $0x2c] ss:$16 sps:$4 sm:$0xff]  }
  0xa4   :  { %1660 = vmatprep.subr.bf16.mxu1 %v5241_v5  ;;  %v5321_v5 = vld [vmem:[#allocation5 + $0x520] ss:$16 sps:$4 sm:$0xff]  }
  0xa5   :  { %1570 = vmatmul.mubr.bf16.vlgmr.msra.gmra.mxu0 %v6327_v6 }
  0xa6   :  { %1611 = vmatmul.mubr.bf16.vlgmr.msra.gmra.mxu1 %v6329_v7  ;;  %1620 = vmatpush1.bf16.msra.mxu0 %v5236_v8  ;;  %v5324_v8 = vld [vmem:[#allocation5 + $0x28] ss:$16 sps:$4 sm:$0xff]  }
  0xa7   :  { %1661 = vmatpush1.bf16.msra.mxu1 %v5239_v9  ;;  %1621 = vmatprep.subr.bf16.mxu0 %v5244_v10  ;;  %v5329_v9 = vld [vmem:[#allocation5 + $0x504] ss:$16 sps:$4 sm:$0xff]   ;;  %v5332_v10 = vld [vmem:[#allocation5 + $0xc] ss:$16 sps:$4 sm:$0xff]  }
  0xa8   :  { %1662 = vmatprep.subr.bf16.mxu1 %v5247_v11  ;;  %1692 = vmatprep.mubr.bf16.mxu1 %v6222_v16  ;;  %v5327_v11 = vld [vmem:[#allocation5 + $0x500] ss:$16 sps:$4 sm:$0xff]  }
  0xa9   :  { %1651 = vmatprep.mubr.bf16.mxu0 %v6338_v35 }
  0xaa   :  { %1622 = vmatpush1.bf16.msra.mxu0 %v5242_v12  ;;  %v5330_v12 = vld [vmem:[#allocation5 + $0x8] ss:$16 sps:$4 sm:$0xff]  }
  0xab   :  { %1663 = vmatpush1.bf16.msra.mxu1 %v5245_v13  ;;  %1623 = vmatprep.subr.bf16.mxu0 %v5250_v14  ;;  %v5337_v13 = vld [vmem:[#allocation5 + $0x1ec] ss:$16 sps:$4 sm:$0xff]  }
  0xac   :  { %1664 = vmatprep.subr.bf16.mxu1 %v5253_v15  ;;  %v5340_v14 = vld [vmem:[#allocation5 + $0x2ec] ss:$16 sps:$4 sm:$0xff]   ;;  %v6344_v15 = vcombine.low %v6334_v33, %v6334_v33  ;;  %v5359_v33 = vld [vmem:[#allocation5 + $0x168] ss:$16 sps:$4 sm:$0xff]  }
  0xae   :  { %1624 = vmatpush1.bf16.msra.mxu0 %v5248_v17  ;;  %v5335_v17 = vld [vmem:[#allocation5 + $0x1e8] ss:$16 sps:$4 sm:$0xff]  }
  0xaf   :  { %1665 = vmatpush1.bf16.msra.mxu1 %v5251_v18  ;;  %1625 = vmatprep.subr.bf16.mxu0 %v5256_v19  ;;  %v5338_v18 = vld [vmem:[#allocation5 + $0x2e8] ss:$16 sps:$4 sm:$0xff]   ;;  %v5343_v19 = vld [vmem:[#allocation5 + $0x1cc] ss:$16 sps:$4 sm:$0xff]  }
  0xb0   :  { %1666 = vmatprep.subr.bf16.mxu1 %v5259_v20  ;;  %v5346_v20 = vld [vmem:[#allocation5 + $0x2cc] ss:$16 sps:$4 sm:$0xff]  }
  0xb2   :  { %1626 = vmatpush1.bf16.msra.mxu0 %v5254_v21  ;;  %v5341_v21 = vld [vmem:[#allocation5 + $0x1c8] ss:$16 sps:$4 sm:$0xff]  }
  0xb3   :  { %1667 = vmatpush1.bf16.msra.mxu1 %v5257_v22  ;;  %1627 = vmatprep.subr.bf16.mxu0 %v5262_v23  ;;  %v5344_v22 = vld [vmem:[#allocation5 + $0x2c8] ss:$16 sps:$4 sm:$0xff]   ;;  %v5349_v23 = vld [vmem:[#allocation5 + $0x1ac] ss:$16 sps:$4 sm:$0xff]  }
  0xb4   :  { %1668 = vmatprep.subr.bf16.mxu1 %v5265_v24  ;;  %v5352_v24 = vld [vmem:[#allocation5 + $0x2ac] ss:$16 sps:$4 sm:$0xff]  }
  0xb6   :  { %1628 = vmatpush1.bf16.msra.mxu0 %v5260_v25  ;;  %v5347_v25 = vld [vmem:[#allocation5 + $0x1a8] ss:$16 sps:$4 sm:$0xff]  }
  0xb7   :  { %1669 = vmatpush1.bf16.msra.mxu1 %v5263_v26  ;;  %1629 = vmatprep.subr.bf16.mxu0 %v5268_v27  ;;  %v5350_v26 = vld [vmem:[#allocation5 + $0x2a8] ss:$16 sps:$4 sm:$0xff]   ;;  %v5355_v27 = vld [vmem:[#allocation5 + $0x18c] ss:$16 sps:$4 sm:$0xff]  }
  0xb8   :  { %1670 = vmatprep.subr.bf16.mxu1 %v5271_v28  ;;  %v5358_v28 = vld [vmem:[#allocation5 + $0x28c] ss:$16 sps:$4 sm:$0xff]  }
  0xba   :  { %1630 = vmatpush1.bf16.msra.mxu0 %v5266_v29  ;;  %v5353_v29 = vld [vmem:[#allocation5 + $0x188] ss:$16 sps:$4 sm:$0xff]  }
  0xbb   :  { %1671 = vmatpush1.bf16.msra.mxu1 %v5269_v30  ;;  %1631 = vmatprep.subr.bf16.mxu0 %v5274_v31  ;;  %v5356_v30 = vld [vmem:[#allocation5 + $0x288] ss:$16 sps:$4 sm:$0xff]   ;;  %v5361_v31 = vld [vmem:[#allocation5 + $0x16c] ss:$16 sps:$4 sm:$0xff]  }
  0xbc   :  { %1672 = vmatprep.subr.bf16.mxu1 %v5277_v32  ;;  %v5364_v32 = vld [vmem:[#allocation5 + $0x26c] ss:$16 sps:$4 sm:$0xff]  }
  0xbe   :  { %1632 = vmatpush1.bf16.msra.mxu0 %v5272_v34  ;;  %v5367_v34 = vld [vmem:[#allocation5 + $0x14c] ss:$16 sps:$4 sm:$0xff]  }
  0xbf   :  { %1673 = vmatpush1.bf16.msra.mxu1 %v5275_v36  ;;  %1633 = vmatprep.subr.bf16.mxu0 %v5280_v37  ;;  %v5370_v36 = vld [vmem:[#allocation5 + $0x24c] ss:$16 sps:$4 sm:$0xff]   ;;  %v5365_v37 = vld [vmem:[#allocation5 + $0x148] ss:$16 sps:$4 sm:$0xff]  }
  0xc0   :  { %1674 = vmatprep.subr.bf16.mxu1 %v5283_v38  ;;  %v5368_v38 = vld [vmem:[#allocation5 + $0x248] ss:$16 sps:$4 sm:$0xff]  }
  0xc2   :  { %1634 = vmatpush1.bf16.msra.mxu0 %v5278_v39  ;;  %v5373_v39 = vld [vmem:[#allocation5 + $0x12c] ss:$16 sps:$4 sm:$0xff]  }
  0xc3   :  { %1675 = vmatpush1.bf16.msra.mxu1 %v5281_v40  ;;  %1635 = vmatprep.subr.bf16.mxu0 %v5286_v41  ;;  %v5376_v40 = vld [vmem:[#allocation5 + $0x22c] ss:$16 sps:$4 sm:$0xff]   ;;  %v5371_v41 = vld [vmem:[#allocation5 + $0x128] ss:$16 sps:$4 sm:$0xff]  }
  0xc4   :  { %1701 = vmatprep.subr.bf16.mxu1 %v5290_v42  ;;  %v5374_v42 = vld [vmem:[#allocation5 + $0x228] ss:$16 sps:$4 sm:$0xff]  }
  0xc6   :  { %1693 = vmatmul.mubr.bf16.vlgmr.msra.gmra.mxu1 %v5287_v44  ;;  %1636 = vmatpush2.bf16.msra.mxu0 %v5284_v43  ;;  %v5379_v43 = vld [vmem:[#allocation5 + $0x10c] ss:$16 sps:$4 sm:$0xff]  }
  0xc7   :  { %1702 = vmatpush1.bf16.msra.mxu1 %v5288_v45  ;;  %1637 = vmatprep.subr.bf16.mxu0 %v5293_v46  ;;  %v5382_v44 = vld [vmem:[#allocation5 + $0x20c] ss:$16 sps:$4 sm:$0xff]   ;;  %v5377_v45 = vld [vmem:[#allocation5 + $0x108] ss:$16 sps:$4 sm:$0xff]  }
  0xc8   :  { %1703 = vmatprep.subr.bf16.mxu1 %v5296_v48  ;;  %1733 = vmatprep.mubr.bf16.mxu1 %v6321_v47  ;;  %v5312_v47 = vld [vmem:[#allocation5 + $0x68] ss:$16 sps:$4 sm:$0xff]   ;;  %v5385_v48 = vld [vmem:[#allocation5 + $0x3ec] ss:$16 sps:$4 sm:$0xff]  }
  0xc9   :  { %v5380_v46 = vld [vmem:[#allocation5 + $0x208] ss:$16 sps:$4 sm:$0xff]  }
  0xca   :  { %1638 = vmatpush2.bf16.msra.mxu0 %v5291_v49  ;;  %v5388_v49 = vld [vmem:[#allocation5 + $0x4ec] ss:$16 sps:$4 sm:$0xff]  }
  0xcb   :  { %1704 = vmatpush1.bf16.msra.mxu1 %v5294_v50  ;;  %1639 = vmatprep.subr.bf16.mxu0 %v5299_v52  ;;  %v5383_v50 = vld [vmem:[#allocation5 + $0x3e8] ss:$16 sps:$4 sm:$0xff]  }
  0xcc   :  { %1705 = vmatprep.subr.bf16.mxu1 %v5302_v53  ;;  %v5386_v52 = vld [vmem:[#allocation5 + $0x4e8] ss:$16 sps:$4 sm:$0xff]   ;;  %v5391_v53 = vld [vmem:[#allocation5 + $0x3cc] ss:$16 sps:$4 sm:$0xff]  }
  0xce   :  { %1640 = vmatpush2.bf16.msra.mxu0 %v5297_v54  ;;  %v5394_v54 = vld [vmem:[#allocation5 + $0x4cc] ss:$16 sps:$4 sm:$0xff]  }
  0xcf   :  { %1706 = vmatpush1.bf16.msra.mxu1 %v5300_v55  ;;  %1641 = vmatprep.subr.bf16.mxu0 %v5305_v56  ;;  %v5389_v55 = vld [vmem:[#allocation5 + $0x3c8] ss:$16 sps:$4 sm:$0xff]  }
  0xd0   :  { %1707 = vmatprep.subr.bf16.mxu1 %v5308_v57  ;;  %v5392_v56 = vld [vmem:[#allocation5 + $0x4c8] ss:$16 sps:$4 sm:$0xff]   ;;  %v5397_v57 = vld [vmem:[#allocation5 + $0x3ac] ss:$16 sps:$4 sm:$0xff]  }
  0xd2   :  { %1642 = vmatpush2.bf16.msra.mxu0 %v5303_v58  ;;  %v5400_v58 = vld [vmem:[#allocation5 + $0x4ac] ss:$16 sps:$4 sm:$0xff]  }
  0xd3   :  { %1708 = vmatpush1.bf16.msra.mxu1 %v5306_v59  ;;  %1643 = vmatprep.subr.bf16.mxu0 %v5311_v60  ;;  %v5395_v59 = vld [vmem:[#allocation5 + $0x3a8] ss:$16 sps:$4 sm:$0xff]  }
  0xd4   :  { %1709 = vmatprep.subr.bf16.mxu1 %v5314_v61  ;;  %v5398_v60 = vld [vmem:[#allocation5 + $0x4a8] ss:$16 sps:$4 sm:$0xff]   ;;  %v5403_v61 = vld [vmem:[#allocation5 + $0x38c] ss:$16 sps:$4 sm:$0xff]  }
  0xd6   :  { %1644 = vmatpush2.bf16.msra.mxu0 %v5309_v62  ;;  %v5406_v62 = vld [vmem:[#allocation5 + $0x48c] ss:$16 sps:$4 sm:$0xff]  }
  0xd7   :  { %1710 = vmatpush1.bf16.msra.mxu1 %v5312_v47  ;;  %1645 = vmatprep.subr.bf16.mxu0 %v5317_v63  ;;  %v5401_v47 = vld [vmem:[#allocation5 + $0x388] ss:$16 sps:$4 sm:$0xff]   ;;  %v5409_v63 = vld [vmem:[#allocation5 + $0x36c] ss:$16 sps:$4 sm:$0xff]  }
  0xd8   :  { %1711 = vmatprep.subr.bf16.mxu1 %v5320_v0  ;;  %v5412_v0 = vld [vmem:[#allocation5 + $0x46c] ss:$16 sps:$4 sm:$0xff]  }
  0xda   :  { %1646 = vmatpush2.bf16.msra.mxu0 %v5315_v1  ;;  %v5407_v1 = vld [vmem:[#allocation5 + $0x368] ss:$16 sps:$4 sm:$0xff]  }
  0xdb   :  { %1712 = vmatpush1.bf16.msra.mxu1 %v5318_v2  ;;  %1647 = vmatprep.subr.bf16.mxu0 %v5323_v3  ;;  %v5410_v2 = vld [vmem:[#allocation5 + $0x468] ss:$16 sps:$4 sm:$0xff]   ;;  %v5415_v3 = vld [vmem:[#allocation5 + $0x34c] ss:$16 sps:$4 sm:$0xff]  }
  0xdc   :  { %1713 = vmatprep.subr.bf16.mxu1 %v5326_v4  ;;  %v5418_v4 = vld [vmem:[#allocation5 + $0x44c] ss:$16 sps:$4 sm:$0xff]  }
  0xde   :  { %1648 = vmatpush2.bf16.msra.mxu0 %v5321_v5  ;;  %v5416_v5 = vld [vmem:[#allocation5 + $0x448] ss:$16 sps:$4 sm:$0xff]  }
  0xdf   :  { %1714 = vmatpush1.bf16.msra.mxu1 %v5324_v8  ;;  %1649 = vmatprep.subr.bf16.mxu0 %v5329_v9  ;;  %v5421_v8 = vld [vmem:[#allocation5 + $0x32c] ss:$16 sps:$4 sm:$0xff]  }
  0xe0   :  { %1715 = vmatprep.subr.bf16.mxu1 %v5332_v10  ;;  %v5424_v9 = vld [vmem:[#allocation5 + $0x42c] ss:$16 sps:$4 sm:$0xff]   ;;  %v5419_v10 = vld [vmem:[#allocation5 + $0x328] ss:$16 sps:$4 sm:$0xff]  }
  0xe2   :  { %1650 = vmatpush2.bf16.msra.mxu0 %v5327_v11  ;;  %v5422_v11 = vld [vmem:[#allocation5 + $0x428] ss:$16 sps:$4 sm:$0xff]  }
  0xe3   :  { %1716 = vmatpush1.bf16.msra.mxu1 %v5330_v12  ;;  %1742 = vmatprep.subr.bf16.mxu0 %v5340_v14  ;;  %v5427_v12 = vld [vmem:[#allocation5 + $0x30c] ss:$16 sps:$4 sm:$0xff]   ;;  %v5425_v14 = vld [vmem:[#allocation5 + $0x308] ss:$16 sps:$4 sm:$0xff]  }
  0xe4   :  { %1717 = vmatprep.subr.bf16.mxu1 %v5337_v13  ;;  %v5430_v13 = vld [vmem:[#allocation5 + $0x40c] ss:$16 sps:$4 sm:$0xff]  }
  0xe5   :  { %1652 = vmatmul.mubr.bf16.vlgmr.msra.gmra.mxu0 %v6344_v15 }
  0xe6   :  { %1743 = vmatpush1.bf16.msra.mxu0 %v5338_v18  ;;  %1774 = vmatprep.mubr.bf16.mxu0 %v6323_v51  ;;  %v5362_v51 = vld [vmem:[#allocation5 + $0x268] ss:$16 sps:$4 sm:$0xff]   ;;  %v5433_v18 = vld [vmem:[#allocation5 + $0x5ec] ss:$16 sps:$4 sm:$0xff]  }
  0xe7   :  { %1718 = vmatpush2.bf16.msra.mxu1 %v5335_v17  ;;  %1744 = vmatprep.subr.bf16.mxu0 %v5346_v20  ;;  %v5428_v17 = vld [vmem:[#allocation5 + $0x408] ss:$16 sps:$4 sm:$0xff]  }
  0xe8   :  { %1719 = vmatprep.subr.bf16.mxu1 %v5343_v19  ;;  %v5436_v19 = vld [vmem:[#allocation5 + $0x6ec] ss:$16 sps:$4 sm:$0xff]   ;;  %v5431_v20 = vld [vmem:[#allocation5 + $0x5e8] ss:$16 sps:$4 sm:$0xff]  }
  0xea   :  { %1745 = vmatpush1.bf16.msra.mxu0 %v5344_v22  ;;  %v5439_v22 = vld [vmem:[#allocation5 + $0x5cc] ss:$16 sps:$4 sm:$0xff]  }
  0xeb   :  { %1720 = vmatpush2.bf16.msra.mxu1 %v5341_v21  ;;  %1746 = vmatprep.subr.bf16.mxu0 %v5352_v24  ;;  %v5434_v21 = vld [vmem:[#allocation5 + $0x6e8] ss:$16 sps:$4 sm:$0xff]  }
  0xec   :  { %1721 = vmatprep.subr.bf16.mxu1 %v5349_v23  ;;  %v5442_v23 = vld [vmem:[#allocation5 + $0x6cc] ss:$16 sps:$4 sm:$0xff]   ;;  %v5437_v24 = vld [vmem:[#allocation5 + $0x5c8] ss:$16 sps:$4 sm:$0xff]  }
  0xee   :  { %1747 = vmatpush1.bf16.msra.mxu0 %v5350_v26  ;;  %v5445_v26 = vld [vmem:[#allocation5 + $0x5ac] ss:$16 sps:$4 sm:$0xff]  }
  0xef   :  { %1722 = vmatpush2.bf16.msra.mxu1 %v5347_v25  ;;  %1748 = vmatprep.subr.bf16.mxu0 %v5358_v28  ;;  %v5440_v25 = vld [vmem:[#allocation5 + $0x6c8] ss:$16 sps:$4 sm:$0xff]  }
  0xf0   :  { %1723 = vmatprep.subr.bf16.mxu1 %v5355_v27  ;;  %v5448_v27 = vld [vmem:[#allocation5 + $0x6ac] ss:$16 sps:$4 sm:$0xff]   ;;  %v5443_v28 = vld [vmem:[#allocation5 + $0x5a8] ss:$16 sps:$4 sm:$0xff]  }
  0xf2   :  { %1749 = vmatpush1.bf16.msra.mxu0 %v5356_v30  ;;  %v5451_v30 = vld [vmem:[#allocation5 + $0x58c] ss:$16 sps:$4 sm:$0xff]  }
  0xf3   :  { %1724 = vmatpush2.bf16.msra.mxu1 %v5353_v29  ;;  %1750 = vmatprep.subr.bf16.mxu0 %v5364_v32  ;;  %v5446_v29 = vld [vmem:[#allocation5 + $0x6a8] ss:$16 sps:$4 sm:$0xff]  }
  0xf4   :  { %1725 = vmatprep.subr.bf16.mxu1 %v5361_v31  ;;  %v5454_v31 = vld [vmem:[#allocation5 + $0x68c] ss:$16 sps:$4 sm:$0xff]   ;;  %v5449_v32 = vld [vmem:[#allocation5 + $0x588] ss:$16 sps:$4 sm:$0xff]  }
  0xf6   :  { %1751 = vmatpush1.bf16.msra.mxu0 %v5362_v51  ;;  %v5457_v51 = vld [vmem:[#allocation5 + $0x56c] ss:$16 sps:$4 sm:$0xff]  }
  0xf7   :  { %1726 = vmatpush2.bf16.msra.mxu1 %v5359_v33  ;;  %1752 = vmatprep.subr.bf16.mxu0 %v5370_v36  ;;  %v5452_v33 = vld [vmem:[#allocation5 + $0x688] ss:$16 sps:$4 sm:$0xff]  }
  0xf8   :  { %1727 = vmatprep.subr.bf16.mxu1 %v5367_v34  ;;  %v5455_v34 = vld [vmem:[#allocation5 + $0x568] ss:$16 sps:$4 sm:$0xff]  }
  0xf9   :  { %v5458_v36 = vld [vmem:[#allocation5 + $0x668] ss:$16 sps:$4 sm:$0xff]  }
  0xfa   :  { %1753 = vmatpush1.bf16.msra.mxu0 %v5368_v38  ;;  %v5466_v38 = vld [vmem:[#allocation5 + $0x64c] ss:$16 sps:$4 sm:$0xff]  }
  0xfb   :  { %1728 = vmatpush2.bf16.msra.mxu1 %v5365_v37  ;;  %1754 = vmatprep.subr.bf16.mxu0 %v5376_v40  ;;  %v5463_v37 = vld [vmem:[#allocation5 + $0x54c] ss:$16 sps:$4 sm:$0xff]   ;;  %v5464_v40 = vld [vmem:[#allocation5 + $0x648] ss:$16 sps:$4 sm:$0xff]  }
  0xfc   :  { %1729 = vmatprep.subr.bf16.mxu1 %v5373_v39  ;;  %v5461_v39 = vld [vmem:[#allocation5 + $0x548] ss:$16 sps:$4 sm:$0xff]  }
  0xfe   :  { %1755 = vmatpush1.bf16.msra.mxu0 %v5374_v42  ;;  %v5472_v42 = vld [vmem:[#allocation5 + $0x62c] ss:$16 sps:$4 sm:$0xff]  }
  0xff   :  { %1730 = vmatpush2.bf16.msra.mxu1 %v5371_v41  ;;  %1756 = vmatprep.subr.bf16.mxu0 %v5382_v44  ;;  %v5469_v41 = vld [vmem:[#allocation5 + $0x52c] ss:$16 sps:$4 sm:$0xff]   ;;  %v5470_v44 = vld [vmem:[#allocation5 + $0x628] ss:$16 sps:$4 sm:$0xff]  }
 0x100   :  { %1731 = vmatprep.subr.bf16.mxu1 %v5379_v43  ;;  %v5467_v43 = vld [vmem:[#allocation5 + $0x528] ss:$16 sps:$4 sm:$0xff]  }
 0x102   :  { %1757 = vmatpush1.bf16.msra.mxu0 %v5380_v46  ;;  %v5478_v46 = vld [vmem:[#allocation5 + $0x60c] ss:$16 sps:$4 sm:$0xff]  }
 0x103   :  { %1732 = vmatpush2.bf16.msra.mxu1 %v5377_v45  ;;  %1758 = vmatprep.subr.bf16.mxu0 %v5385_v48  ;;  %v5475_v45 = vld [vmem:[#allocation5 + $0x50c] ss:$16 sps:$4 sm:$0xff]   ;;  %v5473_v48 = vld [vmem:[#allocation5 + $0x508] ss:$16 sps:$4 sm:$0xff]  }
 0x104   :  { %1783 = vmatprep.subr.bf16.mxu1 %v5388_v49  ;;  %v5476_v49 = vld [vmem:[#allocation5 + $0x608] ss:$16 sps:$4 sm:$0xff]  }
 0x106   :  { %1734 = vmatmul.mubr.bf16.vlgmr.msra.gmra.mxu1 %v6327_v6  ;;  %1759 = vmatpush2.bf16.msra.mxu0 %v5383_v50  ;;  %v5404_v6 = vld [vmem:[#allocation5 + $0x488] ss:$16 sps:$4 sm:$0xff]  }
 0x107   :  { %1784 = vmatpush1.bf16.msra.mxu1 %v5386_v52  ;;  %1760 = vmatprep.subr.bf16.mxu0 %v5391_v53  ;;  %v5481_v50 = vld [vmem:[#allocation8 + $0x74] ss:$8 sps:$4 sm:$0xff]   ;;  %v5479_v52 = vld [vmem:[#allocation8 + $0x70] ss:$8 sps:$4 sm:$0xff]   ;;  %v5484_v53 = vld [vmem:[#allocation8 + $0x64] ss:$8 sps:$4 sm:$0xff]  }
 0x108   :  { %1785 = vmatprep.subr.bf16.mxu1 %v5394_v54  ;;  %1815 = vmatprep.mubr.bf16.mxu1 %v6338_v35  ;;  %v5413_v35 = vld [vmem:[#allocation5 + $0x348] ss:$16 sps:$4 sm:$0xff]   ;;  %v5482_v54 = vld [vmem:[#allocation8 + $0x60] ss:$8 sps:$4 sm:$0xff]  }
 0x10a   :  { %1761 = vmatpush2.bf16.msra.mxu0 %v5389_v55  ;;  %v5973_v55 = vld [vmem:[#allocation2 + $0x18] ss:$0 sps:$4 sm:$0xff]  }
 0x10b   :  { %1786 = vmatpush1.bf16.msra.mxu1 %v5392_v56  ;;  %1762 = vmatprep.subr.bf16.mxu0 %v5397_v57  ;;  %v5487_v56 = vld [vmem:[#allocation8 + $0x54] ss:$8 sps:$4 sm:$0xff]   ;;  %v5485_v57 = vld [vmem:[#allocation8 + $0x50] ss:$8 sps:$4 sm:$0xff]  }
 0x10c   :  { %1787 = vmatprep.subr.bf16.mxu1 %v5400_v58  ;;  %v5490_v58 = vld [vmem:[#allocation8 + $0x44] ss:$8 sps:$4 sm:$0xff]  }
 0x10e   :  { %1763 = vmatpush2.bf16.msra.mxu0 %v5395_v59  ;;  %v5527_v59 = vld [vmem:[#allocation8 + $0x170] ss:$8 sps:$4 sm:$0xff]  }
 0x10f   :  { %1788 = vmatpush1.bf16.msra.mxu1 %v5398_v60  ;;  %1764 = vmatprep.subr.bf16.mxu0 %v5403_v61  ;;  %v5529_v60 = vld [vmem:[#allocation8 + $0x174] ss:$8 sps:$4 sm:$0xff]   ;;  %v5532_v61 = vld [vmem:[#allocation8 + $0x164] ss:$8 sps:$4 sm:$0xff]  }
 0x110   :  { %1789 = vmatprep.subr.bf16.mxu1 %v5406_v62  ;;  %v5488_v62 = vld [vmem:[#allocation8 + $0x40] ss:$8 sps:$4 sm:$0xff]  }
 0x112   :  { %1765 = vmatpush2.bf16.msra.mxu0 %v5401_v47  ;;  %v5493_v47 = vld [vmem:[#allocation8 + $0x34] ss:$8 sps:$4 sm:$0xff]  }
 0x113   :  { %1790 = vmatpush1.bf16.msra.mxu1 %v5404_v6  ;;  %1766 = vmatprep.subr.bf16.mxu0 %v5409_v63  ;;  %v5530_v6 = vld [vmem:[#allocation8 + $0x160] ss:$8 sps:$4 sm:$0xff]   ;;  %v5535_v63 = vld [vmem:[#allocation8 + $0x154] ss:$8 sps:$4 sm:$0xff]  }
 0x114   :  { %1791 = vmatprep.subr.bf16.mxu1 %v5412_v0  ;;  %v5533_v0 = vld [vmem:[#allocation8 + $0x150] ss:$8 sps:$4 sm:$0xff]  }
 0x116   :  { %1767 = vmatpush2.bf16.msra.mxu0 %v5407_v1  ;;  %v5496_v1 = vld [vmem:[#allocation8 + $0x24] ss:$8 sps:$4 sm:$0xff]  }
 0x117   :  { %1792 = vmatpush1.bf16.msra.mxu1 %v5410_v2  ;;  %1768 = vmatprep.subr.bf16.mxu0 %v5415_v3  ;;  %v5538_v2 = vld [vmem:[#allocation8 + $0x144] ss:$8 sps:$4 sm:$0xff]   ;;  %v5494_v3 = vld [vmem:[#allocation8 + $0x20] ss:$8 sps:$4 sm:$0xff]  }
 0x118   :  { %1793 = vmatprep.subr.bf16.mxu1 %v5418_v4  ;;  %v5536_v4 = vld [vmem:[#allocation8 + $0x140] ss:$8 sps:$4 sm:$0xff]  }
 0x11a   :  { %1769 = vmatpush2.bf16.msra.mxu0 %v5413_v35  ;;  %v5499_v35 = vld [vmem:[#allocation8 + $0x14] ss:$8 sps:$4 sm:$0xff]  }
 0x11b   :  { %1794 = vmatpush1.bf16.msra.mxu1 %v5416_v5  ;;  %1770 = vmatprep.subr.bf16.mxu0 %v5421_v8  ;;  %v5541_v5 = vld [vmem:[#allocation8 + $0x134] ss:$8 sps:$4 sm:$0xff]   ;;  %v5497_v8 = vld [vmem:[#allocation8 + $0x10] ss:$8 sps:$4 sm:$0xff]  }
 0x11c   :  { %1795 = vmatprep.subr.bf16.mxu1 %v5424_v9  ;;  %v5539_v9 = vld [vmem:[#allocation8 + $0x130] ss:$8 sps:$4 sm:$0xff]  }
 0x11e   :  { %1771 = vmatpush2.bf16.msra.mxu0 %v5419_v10  ;;  %v5502_v10 = vld [vmem:[#allocation8 + $0x4] ss:$8 sps:$4 sm:$0xff]  }
 0x11f   :  { %1796 = vmatpush1.bf16.msra.mxu1 %v5422_v11  ;;  %1772 = vmatprep.subr.bf16.mxu0 %v5427_v12  ;;  %v5500_v11 = vld [vmem:[#allocation8] ss:$8 sps:$4 sm:$0xff]   ;;  %v5505_v12 = vld [vmem:[#allocation8 + $0xf4] ss:$8 sps:$4 sm:$0xff]  }
 0x120   :  { %1797 = vmatprep.subr.bf16.mxu1 %v5430_v13  ;;  %v5503_v13 = vld [vmem:[#allocation8 + $0xf0] ss:$8 sps:$4 sm:$0xff]  }
 0x122   :  { %1773 = vmatpush2.bf16.msra.mxu0 %v5425_v14  ;;  %v5508_v14 = vld [vmem:[#allocation8 + $0xe4] ss:$8 sps:$4 sm:$0xff]  }
 0x123   :  { %1798 = vmatpush1.bf16.msra.mxu1 %v5428_v17  ;;  %1824 = vmatprep.subr.bf16.mxu0 %v5436_v19  ;;  %v5544_v17 = vld [vmem:[#allocation8 + $0x124] ss:$8 sps:$4 sm:$0xff]   ;;  %v5542_v19 = vld [vmem:[#allocation8 + $0x120] ss:$8 sps:$4 sm:$0xff]  }
 0x124   :  { %1799 = vmatprep.subr.bf16.mxu1 %v5433_v18  ;;  %v5506_v18 = vld [vmem:[#allocation8 + $0xe0] ss:$8 sps:$4 sm:$0xff]  }
 0x125   :  { %1775 = vmatmul.mubr.bf16.vlgmr.msra.gmra.mxu0 %v6329_v7  ;;  %v5460_v7 = vld [vmem:[#allocation5 + $0x66c] ss:$16 sps:$4 sm:$0xff]  }
 0x126   :  { %1825 = vmatpush1.bf16.msra.mxu0 %v5434_v21  ;;  %1856 = vmatprep.mubr.bf16.mxu0 %v6222_v16 }
 0x127   :  { %1800 = vmatpush2.bf16.msra.mxu1 %v5431_v20  ;;  %1826 = vmatprep.subr.bf16.mxu0 %v5442_v23 }
 0x128   :  { %1801 = vmatprep.subr.bf16.mxu1 %v5439_v22  ;;  %v5511_v22 = vld [vmem:[#allocation8 + $0xd4] ss:$8 sps:$4 sm:$0xff]  }
 0x12a   :  { %1827 = vmatpush1.bf16.msra.mxu0 %v5440_v25  ;;  %v5547_v25 = vld [vmem:[#allocation8 + $0x114] ss:$8 sps:$4 sm:$0xff]  }
 0x12b   :  { %1802 = vmatpush2.bf16.msra.mxu1 %v5437_v24  ;;  %1828 = vmatprep.subr.bf16.mxu0 %v5448_v27  ;;  %v5545_v27 = vld [vmem:[#allocation8 + $0x110] ss:$8 sps:$4 sm:$0xff]  }
 0x12c   :  { %1803 = vmatprep.subr.bf16.mxu1 %v5445_v26  ;;  %v5509_v26 = vld [vmem:[#allocation8 + $0xd0] ss:$8 sps:$4 sm:$0xff]  }
 0x12e   :  { %1829 = vmatpush1.bf16.msra.mxu0 %v5446_v29 }
 0x12f   :  { %1804 = vmatpush2.bf16.msra.mxu1 %v5443_v28  ;;  %1830 = vmatprep.subr.bf16.mxu0 %v5454_v31 }
 0x130   :  { %1805 = vmatprep.subr.bf16.mxu1 %v5451_v30 }
 0x132   :  { %1831 = vmatpush1.bf16.msra.mxu0 %v5452_v33  ;;  %v5548_v33 = vld [vmem:[#allocation8 + $0x100] ss:$8 sps:$4 sm:$0xff]  }
 0x133   :  { %1806 = vmatpush2.bf16.msra.mxu1 %v5449_v32  ;;  %1832 = vmatprep.subr.bf16.mxu0 %v5460_v7  ;;  %v5514_v32 = vld [vmem:[#allocation8 + $0xc4] ss:$8 sps:$4 sm:$0xff]   ;;  %v5553_v7 = vld [vmem:[#allocation8 + $0x1f4] ss:$8 sps:$4 sm:$0xff]  }
 0x134   :  { %1807 = vmatprep.subr.bf16.mxu1 %v5457_v51  ;;  %v5550_v51 = vld [vmem:[#allocation8 + $0x104] ss:$8 sps:$4 sm:$0xff]  }
 0x136   :  { %1833 = vmatpush1.bf16.msra.mxu0 %v5458_v36  ;;  %v5517_v36 = vld [vmem:[#allocation8 + $0xb4] ss:$8 sps:$4 sm:$0xff]  }
 0x137   :  { %1808 = vmatpush2.bf16.msra.mxu1 %v5455_v34  ;;  %1834 = vmatprep.subr.bf16.mxu0 %v5466_v38  ;;  %v5512_v34 = vld [vmem:[#allocation8 + $0xc0] ss:$8 sps:$4 sm:$0xff]   ;;  %v5556_v38 = vld [vmem:[#allocation8 + $0x1e4] ss:$8 sps:$4 sm:$0xff]  }
 0x138   :  { %1809 = vmatprep.subr.bf16.mxu1 %v5463_v37  ;;  %v5551_v37 = vld [vmem:[#allocation8 + $0x1f0] ss:$8 sps:$4 sm:$0xff]  }
 0x13a   :  { %1835 = vmatpush1.bf16.msra.mxu0 %v5464_v40  ;;  %v5554_v40 = vld [vmem:[#allocation8 + $0x1e0] ss:$8 sps:$4 sm:$0xff]  }
 0x13b   :  { %1810 = vmatpush2.bf16.msra.mxu1 %v5461_v39  ;;  %1836 = vmatprep.subr.bf16.mxu0 %v5472_v42  ;;  %v5515_v39 = vld [vmem:[#allocation8 + $0xb0] ss:$8 sps:$4 sm:$0xff]   ;;  %v5559_v42 = vld [vmem:[#allocation8 + $0x1d4] ss:$8 sps:$4 sm:$0xff]  }
 0x13c   :  { %1811 = vmatprep.subr.bf16.mxu1 %v5469_v41  ;;  %v5520_v41 = vld [vmem:[#allocation8 + $0xa4] ss:$8 sps:$4 sm:$0xff]  }
 0x13e   :  { %1837 = vmatpush1.bf16.msra.mxu0 %v5470_v44  ;;  %v5557_v44 = vld [vmem:[#allocation8 + $0x1d0] ss:$8 sps:$4 sm:$0xff]  }
 0x13f   :  { %1812 = vmatpush2.bf16.msra.mxu1 %v5467_v43  ;;  %1838 = vmatprep.subr.bf16.mxu0 %v5478_v46  ;;  %v5518_v43 = vld [vmem:[#allocation8 + $0xa0] ss:$8 sps:$4 sm:$0xff]   ;;  %v5562_v46 = vld [vmem:[#allocation8 + $0x1c4] ss:$8 sps:$4 sm:$0xff]  }
 0x140   :  { %1813 = vmatprep.subr.bf16.mxu1 %v5475_v45  ;;  %v5523_v45 = vld [vmem:[#allocation8 + $0x94] ss:$8 sps:$4 sm:$0xff]  }
 0x142   :  { %1839 = vmatpush1.bf16.msra.mxu0 %v5476_v49  ;;  %v5560_v49 = vld [vmem:[#allocation8 + $0x1c0] ss:$8 sps:$4 sm:$0xff]  }
 0x143   :  { %1814 = vmatpush2.bf16.msra.mxu1 %v5473_v48  ;;  %2269 = vmatprep.subr.bf16.mxu0 %v5481_v50  ;;  %v5521_v48 = vld [vmem:[#allocation8 + $0x90] ss:$8 sps:$4 sm:$0xff]   ;;  %v5526_v50 = vld [vmem:[#allocation8 + $0x84] ss:$8 sps:$4 sm:$0xff]  }
 0x144   :  { %2310 = vmatprep.subr.bf16.mxu1 %v5529_v60  ;;  %v5569_v60 = vld [vmem:[#allocation8 + $0x190] ss:$8 sps:$4 sm:$0xff]  }
 0x145   :  { %1857 = vmatmul.mubr.bf16.vlgmr.msra.gmra.mxu0 %v5973_v55  ;;  %v5568_v55 = vld [vmem:[#allocation8 + $0x1a4] ss:$8 sps:$4 sm:$0xff]  }
 0x146   :  { %1816 = vmatmul.mubr.bf16.vlgmr.msra.gmra.mxu1 %v6344_v15  ;;  %2270 = vmatpush1.bf16.msra.mxu0 %v5479_v52  ;;  %v5491_v15 = vld [vmem:[#allocation8 + $0x30] ss:$8 sps:$4 sm:$0xff]   ;;  %v5565_v52 = vld [vmem:[#allocation8 + $0x1b4] ss:$8 sps:$4 sm:$0xff]  }
 0x147   :  { %2271 = vmatprep.subr.bf16.mxu0 %v5484_v53  ;;  %2311 = vmatpush1.bf16.msra.mxu1 %v5527_v59  ;;  %v5524_v53 = vld [vmem:[#allocation8 + $0x80] ss:$8 sps:$4 sm:$0xff]   ;;  %v5571_v59 = vld [vmem:[#allocation8 + $0x194] ss:$8 sps:$4 sm:$0xff]  }
 0x148   :  { %2312 = vmatprep.subr.bf16.mxu1 %v5532_v61 }
 0x14a   :  { %2272 = vmatpush1.bf16.msra.mxu0 %v5482_v54  ;;  %v5563_v54 = vld [vmem:[#allocation8 + $0x1b0] ss:$8 sps:$4 sm:$0xff]  }
 0x14b   :  { %2273 = vmatprep.subr.bf16.mxu0 %v5487_v56  ;;  %2313 = vmatpush1.bf16.msra.mxu1 %v5530_v6  ;;  %v5566_v56 = vld [vmem:[#allocation8 + $0x1a0] ss:$8 sps:$4 sm:$0xff]  }
 0x14c   :  { %2314 = vmatprep.subr.bf16.mxu1 %v5535_v63  ;;  %v5572_v6 = vld [vmem:[#allocation8 + $0x180] ss:$8 sps:$4 sm:$0xff]   ;;  %v372_v63 = vlaneseq }
 0x14e   :  { %2274 = vmatpush1.bf16.msra.mxu0 %v5485_v57 }
 0x14f   :  { %2275 = vmatprep.subr.bf16.mxu0 %v5490_v58  ;;  %2315 = vmatpush1.bf16.msra.mxu1 %v5533_v0 }
 0x150   :  { %2316 = vmatprep.subr.bf16.mxu1 %v5538_v2 }
 0x152   :  { %2276 = vmatpush1.bf16.msra.mxu0 %v5488_v62 }
 0x153   :  { %2277 = vmatprep.subr.bf16.mxu0 %v5493_v47  ;;  %2317 = vmatpush1.bf16.msra.mxu1 %v5536_v4  ;;  %v5574_v47 = vld [vmem:[#allocation8 + $0x184] ss:$8 sps:$4 sm:$0xff]  }
 0x154   :  { %2318 = vmatprep.subr.bf16.mxu1 %v5541_v5 }
 0x156   :  { %2278 = vmatpush1.bf16.msra.mxu0 %v5491_v15  ;;  %v6361_v15 = vshrl.u32 %v372_v63, 7  ;;  %v5589_v63 = vld [vmem:[#allocation11 + $0xa4] ss:$16 sps:$4 sm:$0xff]  }
 0x157   :  { %2279 = vmatprep.subr.bf16.mxu0 %v5496_v1  ;;  %2319 = vmatpush1.bf16.msra.mxu1 %v5539_v9  ;;  %v370_v1 = vld [vmem:[#allocation7] sm:$0xf] }
 0x158   :  { %2320 = vmatprep.subr.bf16.mxu1 %v5544_v17  ;;  %v6364_v0 = vsub.s32 0, %v6361_v15  ;;  %v6367_v2 = vsub.s32 1, %v6361_v15 }
 0x15a   :  { %2280 = vmatpush1.bf16.msra.mxu0 %v5494_v3  ;;  %v375_v3 = vrot.slane %v370_v1, %v6364_v0  ;;  %v379_v4 = vrot.slane %v370_v1, %v6367_v2 }
 0x15b   :  { %2281 = vmatprep.subr.bf16.mxu0 %v5499_v35  ;;  %2321 = vmatpush1.bf16.msra.mxu1 %v5542_v19 }
 0x15c   :  { %2322 = vmatprep.subr.bf16.mxu1 %v5547_v25 }
 0x15e   :  { %2282 = vmatpush1.bf16.msra.mxu0 %v5497_v8 }
 0x15f   :  { %2283 = vmatprep.subr.bf16.mxu0 %v5502_v10  ;;  %2323 = vmatpush1.bf16.msra.mxu1 %v5545_v27 }
 0x160   :  { %2324 = vmatprep.subr.bf16.mxu1 %v5550_v51  ;;  %v5580_v51 = vld [vmem:[#allocation11 + $0xec] ss:$16 sps:$4 sm:$0xff]  }
 0x162   :  { %2284 = vmatpush1.bf16.msra.mxu0 %v5500_v11 }
 0x163   :  { %2285 = vmatprep.subr.bf16.mxu0 %v5505_v12  ;;  %2325 = vmatpush1.bf16.msra.mxu1 %v5548_v33  ;;  %v5577_v33 = vld [vmem:[#allocation11 + $0xe4] ss:$16 sps:$4 sm:$0xff]  }
 0x164   :  { %2326 = vmatprep.subr.bf16.mxu1 %v5553_v7  ;;  %v6377_v7 = vsub.s32 2, %v6361_v15 }
 0x165   :  { %v6353_v20 = vpop.f32.mrf.mxu0 }
 0x166   :  { %v6355_v21 = vpop.f32.mrf.mxu1  ;;  %2286 = vmatpush2.bf16.msra.mxu0 %v5503_v13  ;;  %v1572_v35 = vadd.f32 %v6353_v20, %v375_v3  ;;  %v5587_v3 = vld [vmem:[#allocation11 + $0xa0] ss:$16 sps:$4 sm:$0xff]  }
 0x167   :  { %v6357_v23 = vpop.f32.mrf.mxu0  ;;  %2287 = vmatprep.subr.bf16.mxu0 %v5508_v14  ;;  %2327 = vmatpush2.bf16.msra.mxu1 %v5551_v37 }
 0x168   :  { %v6359_v24 = vpop.f32.mrf.mxu1  ;;  %2328 = vmatprep.subr.bf16.mxu1 %v5556_v38  ;;  %v1574_v5 = vadd.f32 %v6357_v23, %v379_v4  ;;  %v1613_v8 = vadd.f32 %v6355_v21, %v1572_v35  ;;  %v5590_v4 = vld [vmem:[#allocation11 + $0xa8] ss:$16 sps:$4 sm:$0xff]   ;;  %v5595_v35 = vld [vmem:[#allocation11 + $0x84] ss:$16 sps:$4 sm:$0xff]  }
 0x169   :  { %v1575_v28 = vpop.f32.mrf.mxu0 }
 0x16a   :  { %v1616_v29 = vpop.f32.mrf.mxu1  ;;  %2288 = vmatpush2.bf16.msra.mxu0 %v5506_v18  ;;  %v1615_v10 = vadd.f32 %v6359_v24, %v1574_v5  ;;  %v5598_v5 = vld [vmem:[#allocation11 + $0x8c] ss:$16 sps:$4 sm:$0xff]  }
 0x16b   :  { %v1576_v30 = vpop.f32.mrf.mxu0  ;;  %2289 = vmatprep.subr.bf16.mxu0 %v5511_v22  ;;  %2329 = vmatpush2.bf16.msra.mxu1 %v5554_v40 }
 0x16c   :  { %v1617_v31 = vpop.f32.mrf.mxu1  ;;  %2330 = vmatprep.subr.bf16.mxu1 %v5559_v42 }
 0x16e   :  { %2290 = vmatpush2.bf16.msra.mxu0 %v5509_v26 }
 0x16f   :  { %2291 = vmatprep.subr.bf16.mxu0 %v5514_v32  ;;  %2331 = vmatpush2.bf16.msra.mxu1 %v5557_v44  ;;  %v5575_v32 = vld [vmem:[#allocation11 + $0xe0] ss:$16 sps:$4 sm:$0xff]  }
 0x170   :  { %2332 = vmatprep.subr.bf16.mxu1 %v5562_v46 }
 0x172   :  { %2292 = vmatpush2.bf16.msra.mxu0 %v5512_v34  ;;  %v6380_v34 = vsub.s32 3, %v6361_v15 }
 0x173   :  { %2293 = vmatprep.subr.bf16.mxu0 %v5517_v36  ;;  %2333 = vmatpush2.bf16.msra.mxu1 %v5560_v49  ;;  %v383_v36 = vrot.slane %v370_v1, %v6377_v7 }
 0x174   :  { %2334 = vmatprep.subr.bf16.mxu1 %v5565_v52  ;;  %v387_v37 = vrot.slane %v370_v1, %v6380_v34  ;;  %v5592_v1 = vld [vmem:[#allocation11 + $0xac] ss:$16 sps:$4 sm:$0xff]  }
 0x176   :  { %2294 = vmatpush2.bf16.msra.mxu0 %v5515_v39 }
 0x177   :  { %2295 = vmatprep.subr.bf16.mxu0 %v5520_v41  ;;  %2335 = vmatpush2.bf16.msra.mxu1 %v5563_v54 }
 0x178   :  { %2336 = vmatprep.subr.bf16.mxu1 %v5568_v55 }
 0x17a   :  { %2296 = vmatpush2.bf16.msra.mxu0 %v5518_v43 }
 0x17b   :  { %2297 = vmatprep.subr.bf16.mxu0 %v5523_v45  ;;  %2337 = vmatpush2.bf16.msra.mxu1 %v5566_v56 }
 0x17c   :  { %2338 = vmatprep.subr.bf16.mxu1 %v5571_v59  ;;  %v5578_v59 = vld [vmem:[#allocation11 + $0xe8] ss:$16 sps:$4 sm:$0xff]  }
 0x17e   :  { %2298 = vmatpush2.bf16.msra.mxu0 %v5521_v48 }
 0x17f   :  { %2299 = vmatprep.subr.bf16.mxu0 %v5526_v50  ;;  %2339 = vmatpush2.bf16.msra.mxu1 %v5569_v60 }
 0x180   :  { %2340 = vmatprep.subr.bf16.mxu1 %v5574_v47  ;;  %v5581_v47 = vld [vmem:[#allocation11 + $0xc0] ss:$16 sps:$4 sm:$0xff]  }
 0x182   :  { %2300 = vmatpush2.bf16.msra.mxu0 %v5524_v53 }
 0x183   :  { %2341 = vmatpush2.bf16.msra.mxu1 %v5572_v6  ;;  %2572 = vmatprep.subr.bf16.mxu0 %v5577_v33  ;;  %v5584_v6 = vld [vmem:[#allocation11 + $0xc8] ss:$16 sps:$4 sm:$0xff]   ;;  %v1937_v33 = vld [vmem:[#allocation10] sm:$0x3] }
 0x184   :  { %2613 = vmatprep.subr.bf16.mxu1 %v5580_v51  ;;  %v1942_v51 = vrot.slane %v1937_v33, %v6364_v0 }
 0x186   :  { %v1694_v57 = vpop.f32.mrf.mxu1 }
 0x188   :  { %v1696_v58 = vpop.f32.mrf.mxu1 }
 0x18a   :  { %v1698_v61 = vpop.f32.mrf.mxu1 }
 0x18b   :  { %v5583_v61 = vld [vmem:[#allocation11 + $0xc4] ss:$16 sps:$4 sm:$0xff]  }
 0x18c   :  { %v1699_v62 = vpop.f32.mrf.mxu1 }
 0x18d   :  { %v5586_v62 = vld [vmem:[#allocation11 + $0xcc] ss:$16 sps:$4 sm:$0xff]  }
 0x1a5   :  { %v1653_v9 = vpop.f32.mrf.mxu0 }
 0x1a6   :  { %v1654_v11 = vadd.f32 %v1653_v9, %v1613_v8  ;;  %v5593_v8 = vld [vmem:[#allocation11 + $0x80] ss:$16 sps:$4 sm:$0xff]   ;;  %v5601_v9 = vld [vmem:[#allocation11 + $0x64] ss:$16 sps:$4 sm:$0xff]  }
 0x1a7   :  { %v1655_v12 = vpop.f32.mrf.mxu0 }
 0x1a8   :  { %v1695_v13 = vadd.f32 %v1694_v57, %v1654_v11  ;;  %v1656_v14 = vadd.f32 %v1655_v12, %v1615_v10  ;;  %v5599_v10 = vld [vmem:[#allocation11 + $0x60] ss:$16 sps:$4 sm:$0xff]   ;;  %v5602_v11 = vld [vmem:[#allocation11 + $0x68] ss:$16 sps:$4 sm:$0xff]   ;;  %v5604_v12 = vld [vmem:[#allocation11 + $0x6c] ss:$16 sps:$4 sm:$0xff]  }
 0x1a9   :  { %v1657_v17 = vpop.f32.mrf.mxu0 }
 0x1aa   :  { %v1697_v18 = vadd.f32 %v1696_v58, %v1656_v14  ;;  %v1865_v19 = vmax.f32 %v1695_v13, 0.0  ;;  %v5607_v13 = vld [vmem:[#allocation11 + $0x44] ss:$16 sps:$4 sm:$0xff]   ;;  %v5610_v14 = vld [vmem:[#allocation11 + $0x4c] ss:$16 sps:$4 sm:$0xff]  }
 0x1ab   :  { %v1658_v22 = vpop.f32.mrf.mxu0  ;;  %v5605_v17 = vld [vmem:[#allocation11 + $0x40] ss:$16 sps:$4 sm:$0xff]  }
 0x1ac   :  { %v1866_v25 = vmax.f32 %v1697_v18, 0.0  ;;  %v1869_v27 = vpack.c.bf16 %v1865_v19, %v1865_v19  ;;  %v5608_v18 = vld [vmem:[#allocation11 + $0x48] ss:$16 sps:$4 sm:$0xff]   ;;  %v5613_v19 = vld [vmem:[#allocation11 + $0x24] ss:$16 sps:$4 sm:$0xff]  }
 0x1ad   :  { %v5616_v22 = vld [vmem:[#allocation11 + $0x2c] ss:$16 sps:$4 sm:$0xff]  }
 0x1ae   :  { %v1870_v26 = vpack.c.bf16 %v1866_v25, %v1866_v25  ;;  %v5611_v25 = vld [vmem:[#allocation11 + $0x20] ss:$16 sps:$4 sm:$0xff]  }
 0x1b0   :  { %2301 = vmatprep.mubr.bf16.mxu0 %v1870_v26  ;;  %v5614_v26 = vld [vmem:[#allocation11 + $0x28] ss:$16 sps:$4 sm:$0xff]  }
 0x1b1   :  { %2302 = vmatmul.mubr.bf16.vlgmr.msra.gmra.mxu0 %v1869_v27  ;;  %v5619_v27 = vld [vmem:[#allocation11 + $0x4] ss:$16 sps:$4 sm:$0xff]  }
 0x1b2   :  { %2604 = vmatprep.mubr.bf16.mxu0 %v6222_v16  ;;  %2573 = vmatpush1.bf16.msra.mxu0 %v5575_v32 }
 0x1b3   :  { %2574 = vmatprep.subr.bf16.mxu0 %v5583_v61  ;;  %v5640_v61 = vld [vmem:[#allocation14 + $0x49c] ss:$28 sps:$4 sm:$0xff]  }
 0x1b6   :  { %2575 = vmatpush1.bf16.msra.mxu0 %v5581_v47  ;;  %v5638_v47 = vld [vmem:[#allocation14 + $0x498] ss:$28 sps:$4 sm:$0xff]  }
 0x1b7   :  { %2576 = vmatprep.subr.bf16.mxu0 %v5589_v63  ;;  %v5646_v63 = vld [vmem:[#allocation14 + $0x464] ss:$28 sps:$4 sm:$0xff]  }
 0x1ba   :  { %2577 = vmatpush1.bf16.msra.mxu0 %v5587_v3  ;;  %v5644_v3 = vld [vmem:[#allocation14 + $0x460] ss:$28 sps:$4 sm:$0xff]  }
 0x1bb   :  { %2578 = vmatprep.subr.bf16.mxu0 %v5595_v35  ;;  %v5652_v35 = vld [vmem:[#allocation14 + $0x42c] ss:$28 sps:$4 sm:$0xff]  }
 0x1be   :  { %2579 = vmatpush1.bf16.msra.mxu0 %v5593_v8  ;;  %v5650_v8 = vld [vmem:[#allocation14 + $0x428] ss:$28 sps:$4 sm:$0xff]  }
 0x1bf   :  { %2580 = vmatprep.subr.bf16.mxu0 %v5601_v9  ;;  %v5658_v9 = vld [vmem:[#allocation14 + $0x3f4] ss:$28 sps:$4 sm:$0xff]  }
 0x1c2   :  { %2581 = vmatpush1.bf16.msra.mxu0 %v5599_v10  ;;  %v5653_v10 = vld [vmem:[#allocation14 + $0x70] ss:$28 sps:$4 sm:$0xff]  }
 0x1c3   :  { %2582 = vmatprep.subr.bf16.mxu0 %v5607_v13  ;;  %v5664_v13 = vld [vmem:[#allocation14 + $0x3bc] ss:$28 sps:$4 sm:$0xff]  }
 0x1c6   :  { %v1735_v20 = vpop.f32.mrf.mxu1  ;;  %2583 = vmatpush1.bf16.msra.mxu0 %v5605_v17  ;;  %v5662_v17 = vld [vmem:[#allocation14 + $0x3b8] ss:$28 sps:$4 sm:$0xff]  }
 0x1c7   :  { %v1736_v38 = vadd.f32 %v1735_v20, %v383_v36  ;;  %2584 = vmatprep.subr.bf16.mxu0 %v5613_v19  ;;  %v5622_v20 = vld [vmem:[#allocation11 + $0xc] ss:$16 sps:$4 sm:$0xff]   ;;  %v1946_v36 = vrot.slane %v1937_v33, %v6367_v2  ;;  %v5670_v19 = vld [vmem:[#allocation14 + $0x384] ss:$28 sps:$4 sm:$0xff]  }
 0x1c8   :  { %v1737_v21 = vpop.f32.mrf.mxu1  ;;  %v5686_v33 = vld [vmem:[#allocation14 + $0x658] ss:$28 sps:$4 sm:$0xff]  }
 0x1c9   :  { %v1738_v39 = vadd.f32 %v1737_v21, %v387_v37  ;;  %v5617_v21 = vld [vmem:[#allocation11] ss:$16 sps:$4 sm:$0xff]  }
 0x1ca   :  { %v1739_v23 = vpop.f32.mrf.mxu1  ;;  %2585 = vmatpush1.bf16.msra.mxu0 %v5611_v25  ;;  %v5668_v25 = vld [vmem:[#allocation14 + $0x380] ss:$28 sps:$4 sm:$0xff]  }
 0x1cb   :  { %v5620_v23 = vld [vmem:[#allocation11 + $0x8] ss:$16 sps:$4 sm:$0xff]   ;;  %2586 = vmatprep.subr.bf16.mxu0 %v5619_v27  ;;  %v5676_v27 = vld [vmem:[#allocation14 + $0x6cc] ss:$28 sps:$4 sm:$0xff]  }
 0x1cc   :  { %v1740_v28 = vpop.f32.mrf.mxu1 }
 0x1cd   :  { %v5625_v28 = vld [vmem:[#allocation14 + $0x18c] ss:$28 sps:$4 sm:$0xff]  }
 0x1ce   :  { %2587 = vmatpush1.bf16.msra.mxu0 %v5617_v21  ;;  %v5674_v21 = vld [vmem:[#allocation14 + $0x6c8] ss:$28 sps:$4 sm:$0xff]  }
 0x1cf   :  { %4107 = vmatprep.subr.bf16.mxu0 %v5625_v28  ;;  %v5682_v28 = vld [vmem:[#allocation14 + $0x694] ss:$28 sps:$4 sm:$0xff]  }
 0x1e5   :  { %v1776_v24 = vpop.f32.mrf.mxu0 }
 0x1e6   :  { %v1777_v40 = vadd.f32 %v1776_v24, %v1736_v38  ;;  %v5628_v24 = vld [vmem:[#allocation14 + $0x50c] ss:$28 sps:$4 sm:$0xff]  }
 0x1e7   :  { %v1778_v29 = vpop.f32.mrf.mxu0 }
 0x1e8   :  { %v1779_v43 = vadd.f32 %v1778_v29, %v1738_v39 }
 0x1e9   :  { %v1780_v30 = vpop.f32.mrf.mxu0 }
 0x1eb   :  { %v1781_v31 = vpop.f32.mrf.mxu0 }
 0x205   :  { %v1858_v42 = vpop.f32.mrf.mxu0 }
 0x206   :  { %v1817_v41 = vpop.f32.mrf.mxu1 }
 0x207   :  { %v1818_v44 = vadd.f32 %v1817_v41, %v1777_v40  ;;  %v1860_v46 = vpop.f32.mrf.mxu0 }
 0x208   :  { %v1819_v45 = vpop.f32.mrf.mxu1 }
 0x209   :  { %v1859_v48 = vadd.f32 %v1858_v42, %v1818_v44  ;;  %v1820_v49 = vadd.f32 %v1819_v45, %v1779_v43  ;;  %v1862_v52 = vpop.f32.mrf.mxu0 }
 0x20a   :  { %v1821_v50 = vpop.f32.mrf.mxu1 }
 0x20b   :  { %v1861_v53 = vadd.f32 %v1860_v46, %v1820_v49  ;;  %v1867_v54 = vmax.f32 %v1859_v48, 0.0  ;;  %v1863_v56 = vpop.f32.mrf.mxu0  ;;  %v2354_v48 = vld [vmem:[%s6455_s9] sm:$0xff] }
 0x20c   :  { %v1822_v55 = vpop.f32.mrf.mxu1  ;;  %v5631_v56 = vld [vmem:[#allocation14 + $0x154] ss:$28 sps:$4 sm:$0xff]  }
 0x20d   :  { %v1868_v57 = vmax.f32 %v1861_v53, 0.0  ;;  %v1871_v60 = vpack.c.bf16 %v1867_v54, %v1867_v54  ;;  %v5623_v53 = vld [vmem:[#allocation14 + $0x188] ss:$28 sps:$4 sm:$0xff]  }
 0x20e   :  { %v5626_v54 = vld [vmem:[#allocation14 + $0x508] ss:$28 sps:$4 sm:$0xff]  }
 0x20f   :  { %v1872_v58 = vpack.c.bf16 %v1868_v57, %v1868_v57  ;;  %v5634_v57 = vld [vmem:[#allocation14 + $0x4d4] ss:$28 sps:$4 sm:$0xff]  }
 0x211   :  { %2342 = vmatprep.mubr.bf16.mxu1 %v1872_v58  ;;  %v5629_v58 = vld [vmem:[#allocation14 + $0x150] ss:$28 sps:$4 sm:$0xff]  }
 0x212   :  { %2343 = vmatmul.mubr.bf16.vlgmr.msra.gmra.mxu1 %v1871_v60  ;;  %v5637_v60 = vld [vmem:[#allocation14 + $0x11c] ss:$28 sps:$4 sm:$0xff]  }
 0x213   :  { %2614 = vmatpush1.bf16.msra.mxu1 %v5578_v59  ;;  %2645 = vmatprep.mubr.bf16.mxu1 %v6222_v16  ;;  %v5596_v16 = vld [vmem:[#allocation11 + $0x88] ss:$16 sps:$4 sm:$0xff]   ;;  %v5632_v59 = vld [vmem:[#allocation14 + $0x4d0] ss:$28 sps:$4 sm:$0xff]  }
 0x214   :  { %2615 = vmatprep.subr.bf16.mxu1 %v5586_v62  ;;  %v5635_v62 = vld [vmem:[#allocation14 + $0x118] ss:$28 sps:$4 sm:$0xff]  }
 0x217   :  { %2616 = vmatpush1.bf16.msra.mxu1 %v5584_v6  ;;  %v5643_v6 = vld [vmem:[#allocation14 + $0xe4] ss:$28 sps:$4 sm:$0xff]  }
 0x218   :  { %2617 = vmatprep.subr.bf16.mxu1 %v5592_v1  ;;  %v5641_v1 = vld [vmem:[#allocation14 + $0xe0] ss:$28 sps:$4 sm:$0xff]  }
 0x21b   :  { %2618 = vmatpush1.bf16.msra.mxu1 %v5590_v4  ;;  %v5649_v4 = vld [vmem:[#allocation14 + $0xac] ss:$28 sps:$4 sm:$0xff]  }
 0x21c   :  { %2619 = vmatprep.subr.bf16.mxu1 %v5598_v5  ;;  %v5647_v5 = vld [vmem:[#allocation14 + $0xa8] ss:$28 sps:$4 sm:$0xff]  }
 0x21f   :  { %2620 = vmatpush1.bf16.msra.mxu1 %v5596_v16  ;;  %v5655_v16 = vld [vmem:[#allocation14 + $0x74] ss:$28 sps:$4 sm:$0xff]  }
 0x220   :  { %2621 = vmatprep.subr.bf16.mxu1 %v5604_v12  ;;  %v5661_v12 = vld [vmem:[#allocation14 + $0x3c] ss:$28 sps:$4 sm:$0xff]  }
 0x223   :  { %2622 = vmatpush1.bf16.msra.mxu1 %v5602_v11  ;;  %v5656_v11 = vld [vmem:[#allocation14 + $0x3f0] ss:$28 sps:$4 sm:$0xff]  }
 0x224   :  { %2623 = vmatprep.subr.bf16.mxu1 %v5610_v14  ;;  %v5659_v14 = vld [vmem:[#allocation14 + $0x38] ss:$28 sps:$4 sm:$0xff]  }
 0x227   :  { %2624 = vmatpush1.bf16.msra.mxu1 %v5608_v18  ;;  %v5667_v18 = vld [vmem:[#allocation14 + $0x4] ss:$28 sps:$4 sm:$0xff]  }
 0x228   :  { %2625 = vmatprep.subr.bf16.mxu1 %v5616_v22  ;;  %v5665_v22 = vld [vmem:[#allocation14] ss:$28 sps:$4 sm:$0xff]  }
 0x22b   :  { %2626 = vmatpush1.bf16.msra.mxu1 %v5614_v26  ;;  %v5673_v26 = vld [vmem:[#allocation14 + $0x34c] ss:$28 sps:$4 sm:$0xff]  }
 0x22c   :  { %2627 = vmatprep.subr.bf16.mxu1 %v5622_v20  ;;  %v5671_v20 = vld [vmem:[#allocation14 + $0x348] ss:$28 sps:$4 sm:$0xff]  }
 0x22f   :  { %2628 = vmatpush1.bf16.msra.mxu1 %v5620_v23  ;;  %v5679_v23 = vld [vmem:[#allocation14 + $0x314] ss:$28 sps:$4 sm:$0xff]  }
 0x230   :  { %4148 = vmatprep.subr.bf16.mxu1 %v5628_v24  ;;  %v5677_v24 = vld [vmem:[#allocation14 + $0x310] ss:$28 sps:$4 sm:$0xff]  }
 0x271   :  { %v2303_v29 = vpop.f32.mrf.mxu0 }
 0x272   :  { %v2304_v37 = vadd.f32 %v2303_v29, %v1942_v51  ;;  %v5680_v29 = vld [vmem:[#allocation14 + $0x690] ss:$28 sps:$4 sm:$0xff]   ;;  %v5691_v51 = vld [vmem:[#allocation14 + $0x2a4] ss:$28 sps:$4 sm:$0xff]  }
 0x273   :  { %v2305_v30 = vpop.f32.mrf.mxu0 }
 0x274   :  { %v2306_v39 = vadd.f32 %v2305_v30, %v1946_v36  ;;  %v5685_v30 = vld [vmem:[#allocation14 + $0x2dc] ss:$28 sps:$4 sm:$0xff]   ;;  %v5694_v36 = vld [vmem:[#allocation14 + $0x624] ss:$28 sps:$4 sm:$0xff]  }
 0x275   :  { %v2307_v31 = vpop.f32.mrf.mxu0 }
 0x276   :  { %v5688_v31 = vld [vmem:[#allocation14 + $0x65c] ss:$28 sps:$4 sm:$0xff]  }
 0x277   :  { %v2308_v32 = vpop.f32.mrf.mxu0 }
 0x278   :  { %v5683_v32 = vld [vmem:[#allocation14 + $0x2d8] ss:$28 sps:$4 sm:$0xff]  }
 0x2d2   :  { %v2344_v38 = vpop.f32.mrf.mxu1 }
 0x2d3   :  { %v2345_v40 = vadd.f32 %v2344_v38, %v2304_v37  ;;  %v5689_v37 = vld [vmem:[#allocation14 + $0x2a0] ss:$28 sps:$4 sm:$0xff]  }
 0x2d4   :  { %v2346_v41 = vpop.f32.mrf.mxu1  ;;  %v5692_v38 = vld [vmem:[#allocation14 + $0x620] ss:$28 sps:$4 sm:$0xff]  }
 0x2d5   :  { %4475 = vst [vmem:[#allocation17] sm:$0xff] %v2345_v40  ;;  %v2347_v42 = vadd.f32 %v2346_v41, %v2306_v39  ;;  %v5697_v39 = vld [vmem:[#allocation14 + $0x26c] ss:$28 sps:$4 sm:$0xff]  }
 0x2d6   :  { %v2348_v43 = vpop.f32.mrf.mxu1  ;;  %v5695_v41 = vld [vmem:[#allocation14 + $0x268] ss:$28 sps:$4 sm:$0xff]  }
 0x2d7   :  { %v2351_v44 = vmul.f32 0.5, %v2347_v42  ;;  %4476 = vst [vmem:[#allocation19] sm:$0xff] %v2347_v42  ;;  %v5698_v42 = vld [vmem:[#allocation14 + $0x5e8] ss:$28 sps:$4 sm:$0xff]   ;;  %v5703_v43 = vld [vmem:[#allocation14 + $0x234] ss:$28 sps:$4 sm:$0xff]  }
 0x2d8   :  { %v2349_v45 = vpop.f32.mrf.mxu1 }
 0x2d9   :  { %v2352_v46 = vmul.f32 1.442695, %v2351_v44  ;;  %v5706_v44 = vld [vmem:[#allocation14 + $0x5b4] ss:$28 sps:$4 sm:$0xff]  }
 0x2da   :  { %v5701_v45 = vld [vmem:[#allocation14 + $0x230] ss:$28 sps:$4 sm:$0xff]  }
 0x2db   :  { %5943 = vpow2.f32 %v2352_v46  ;;  %v5704_v46 = vld [vmem:[#allocation14 + $0x5b0] ss:$28 sps:$4 sm:$0xff]  }
 0x2e8   :  { %v5944_v49 = vpop.eup %5943 }
 0x2e9   :  { %v2355_v50 = vmul.f32 %v5944_v49, %v2354_v48  ;;  %v5709_v48 = vld [vmem:[#allocation14 + $0x1fc] ss:$28 sps:$4 sm:$0xff]  }
 0x2ea   :  { %v5712_v49 = vld [vmem:[#allocation14 + $0x57c] ss:$28 sps:$4 sm:$0xff]  }
 0x2eb   :  { %v2356_v52 = vadd.f32 %v2355_v50, %v2345_v40  ;;  %v5700_v40 = vld [vmem:[#allocation14 + $0x5ec] ss:$28 sps:$4 sm:$0xff]   ;;  %v5707_v50 = vld [vmem:[#allocation14 + $0x1f8] ss:$28 sps:$4 sm:$0xff]  }
 0x2ed   :  { %v2357_v55 = vpack.c.bf16 %v2356_v52, %v2356_v52  ;;  %v5710_v52 = vld [vmem:[#allocation14 + $0x578] ss:$28 sps:$4 sm:$0xff]  }
 0x2ef   :  { %2605 = vmatmul.mubr.bf16.vlgmr.msra.gmra.mxu0 %v2357_v55  ;;  %2646 = vmatmul.mubr.bf16.vlgmr.msra.gmra.mxu1 %v2357_v55  ;;  %v5713_v55 = vld [vmem:[#allocation14 + $0x1c0] ss:$28 sps:$4 sm:$0xff]  }
 0x2f0   :  { %4108 = vmatpush1.bf16.msra.mxu0 %v5623_v53  ;;  %4149 = vmatpush1.bf16.msra.mxu1 %v5626_v54  ;;  %v5715_v53 = vld [vmem:[#allocation14 + $0x1c4] ss:$28 sps:$4 sm:$0xff]  }
 0x2f1   :  { %4109 = vmatprep.subr.bf16.mxu0 %v5631_v56  ;;  %4150 = vmatprep.subr.bf16.mxu1 %v5634_v57  ;;  %v5718_v54 = vld [vmem:[#allocation14 + $0x544] ss:$28 sps:$4 sm:$0xff]   ;;  %v5721_v57 = vld [vmem:[#allocation14 + $0x194] ss:$28 sps:$4 sm:$0xff]  }
 0x2f2   :  { %v5716_v56 = vld [vmem:[#allocation14 + $0x540] ss:$28 sps:$4 sm:$0xff]  }
 0x2f4   :  { %4110 = vmatpush1.bf16.msra.mxu0 %v5629_v58  ;;  %4151 = vmatpush1.bf16.msra.mxu1 %v5632_v59  ;;  %v5724_v58 = vld [vmem:[#allocation14 + $0x514] ss:$28 sps:$4 sm:$0xff]   ;;  %v2390_v59 = vld [vmem:[#allocation13] sm:$0xf] }
 0x2f5   :  { %4111 = vmatprep.subr.bf16.mxu0 %v5637_v60  ;;  %4152 = vmatprep.subr.bf16.mxu1 %v5640_v61  ;;  %v2395_v60 = vrot.slane %v2390_v59, %v6364_v0  ;;  %v2403_v61 = vrot.slane %v2390_v59, %v6377_v7 }
 0x2f8   :  { %4112 = vmatpush1.bf16.msra.mxu0 %v5635_v62  ;;  %4153 = vmatpush1.bf16.msra.mxu1 %v5638_v47  ;;  %v2399_v62 = vrot.slane %v2390_v59, %v6367_v2  ;;  %v2407_v47 = vrot.slane %v2390_v59, %v6380_v34  ;;  %v5775_v59 = vld [vmem:[#allocation14 + $0x31c] ss:$28 sps:$4 sm:$0xff]  }
 0x2f9   :  { %4113 = vmatprep.subr.bf16.mxu0 %v5643_v6  ;;  %4154 = vmatprep.subr.bf16.mxu1 %v5646_v63 }
 0x2fc   :  { %4114 = vmatpush1.bf16.msra.mxu0 %v5641_v1  ;;  %4155 = vmatpush1.bf16.msra.mxu1 %v5644_v3 }
 0x2fd   :  { %4115 = vmatprep.subr.bf16.mxu0 %v5649_v4  ;;  %4156 = vmatprep.subr.bf16.mxu1 %v5652_v35 }
 0x300   :  { %4116 = vmatpush1.bf16.msra.mxu0 %v5647_v5  ;;  %4157 = vmatpush1.bf16.msra.mxu1 %v5650_v8 }
 0x301   :  { %4117 = vmatprep.subr.bf16.mxu0 %v5655_v16  ;;  %4158 = vmatprep.subr.bf16.mxu1 %v5658_v9 }
 0x304   :  { %4118 = vmatpush1.bf16.msra.mxu0 %v5653_v10  ;;  %4159 = vmatpush1.bf16.msra.mxu1 %v5656_v11 }
 0x305   :  { %4119 = vmatprep.subr.bf16.mxu0 %v5661_v12  ;;  %4160 = vmatprep.subr.bf16.mxu1 %v5664_v13 }
 0x308   :  { %4120 = vmatpush1.bf16.msra.mxu0 %v5659_v14  ;;  %4161 = vmatpush1.bf16.msra.mxu1 %v5662_v17 }
 0x309   :  { %4121 = vmatprep.subr.bf16.mxu0 %v5667_v18  ;;  %4162 = vmatprep.subr.bf16.mxu1 %v5670_v19 }
 0x30c   :  { %4122 = vmatpush1.bf16.msra.mxu0 %v5665_v22  ;;  %4163 = vmatpush1.bf16.msra.mxu1 %v5668_v25  ;;  %v5719_v22 = vld [vmem:[#allocation14 + $0x190] ss:$28 sps:$4 sm:$0xff]  }
 0x30d   :  { %4123 = vmatprep.subr.bf16.mxu0 %v5673_v26  ;;  %4164 = vmatprep.subr.bf16.mxu1 %v5676_v27  ;;  %v5722_v25 = vld [vmem:[#allocation14 + $0x510] ss:$28 sps:$4 sm:$0xff]  }
 0x310   :  { %4124 = vmatpush2.bf16.msra.mxu0 %v5671_v20  ;;  %4165 = vmatpush2.bf16.msra.mxu1 %v5674_v21  ;;  %v5727_v20 = vld [vmem:[#allocation14 + $0x15c] ss:$28 sps:$4 sm:$0xff]  }
 0x311   :  { %4125 = vmatprep.subr.bf16.mxu0 %v5679_v23  ;;  %4166 = vmatprep.subr.bf16.mxu1 %v5682_v28  ;;  %v5730_v21 = vld [vmem:[#allocation14 + $0x4dc] ss:$28 sps:$4 sm:$0xff]  }
 0x312   :  { %v5725_v23 = vld [vmem:[#allocation14 + $0x158] ss:$28 sps:$4 sm:$0xff]  }
 0x313   :  { %v5728_v28 = vld [vmem:[#allocation14 + $0x4d8] ss:$28 sps:$4 sm:$0xff]  }
 0x314   :  { %4126 = vmatpush2.bf16.msra.mxu0 %v5677_v24  ;;  %4167 = vmatpush2.bf16.msra.mxu1 %v5680_v29  ;;  %v5733_v24 = vld [vmem:[#allocation14 + $0x124] ss:$28 sps:$4 sm:$0xff]  }
 0x315   :  { %4127 = vmatprep.subr.bf16.mxu0 %v5685_v30  ;;  %4168 = vmatprep.subr.bf16.mxu1 %v5688_v31  ;;  %v5736_v29 = vld [vmem:[#allocation14 + $0x4a4] ss:$28 sps:$4 sm:$0xff]  }
 0x316   :  { %v5731_v30 = vld [vmem:[#allocation14 + $0x120] ss:$28 sps:$4 sm:$0xff]  }
 0x317   :  { %v5734_v31 = vld [vmem:[#allocation14 + $0x4a0] ss:$28 sps:$4 sm:$0xff]  }
 0x318   :  { %4128 = vmatpush2.bf16.msra.mxu0 %v5683_v32  ;;  %4169 = vmatpush2.bf16.msra.mxu1 %v5686_v33  ;;  %v5739_v32 = vld [vmem:[#allocation14 + $0xec] ss:$28 sps:$4 sm:$0xff]  }
 0x319   :  { %4129 = vmatprep.subr.bf16.mxu0 %v5691_v51  ;;  %4170 = vmatprep.subr.bf16.mxu1 %v5694_v36  ;;  %v5742_v33 = vld [vmem:[#allocation14 + $0x46c] ss:$28 sps:$4 sm:$0xff]  }
 0x31a   :  { %v5737_v51 = vld [vmem:[#allocation14 + $0xe8] ss:$28 sps:$4 sm:$0xff]  }
 0x31b   :  { %v5740_v36 = vld [vmem:[#allocation14 + $0x468] ss:$28 sps:$4 sm:$0xff]  }
 0x31c   :  { %4130 = vmatpush2.bf16.msra.mxu0 %v5689_v37  ;;  %4171 = vmatpush2.bf16.msra.mxu1 %v5692_v38  ;;  %v5745_v37 = vld [vmem:[#allocation14 + $0xb4] ss:$28 sps:$4 sm:$0xff]  }
 0x31d   :  { %4131 = vmatprep.subr.bf16.mxu0 %v5697_v39  ;;  %4172 = vmatprep.subr.bf16.mxu1 %v5700_v40  ;;  %v5748_v38 = vld [vmem:[#allocation14 + $0x434] ss:$28 sps:$4 sm:$0xff]  }
 0x31e   :  { %v5743_v39 = vld [vmem:[#allocation14 + $0xb0] ss:$28 sps:$4 sm:$0xff]  }
 0x31f   :  { %v5746_v40 = vld [vmem:[#allocation14 + $0x430] ss:$28 sps:$4 sm:$0xff]  }
 0x320   :  { %4132 = vmatpush2.bf16.msra.mxu0 %v5695_v41  ;;  %4173 = vmatpush2.bf16.msra.mxu1 %v5698_v42  ;;  %v5751_v41 = vld [vmem:[#allocation14 + $0x7c] ss:$28 sps:$4 sm:$0xff]  }
 0x321   :  { %4133 = vmatprep.subr.bf16.mxu0 %v5703_v43  ;;  %4174 = vmatprep.subr.bf16.mxu1 %v5706_v44  ;;  %v5754_v42 = vld [vmem:[#allocation14 + $0x3fc] ss:$28 sps:$4 sm:$0xff]  }
 0x322   :  { %v5749_v43 = vld [vmem:[#allocation14 + $0x78] ss:$28 sps:$4 sm:$0xff]  }
 0x323   :  { %v5752_v44 = vld [vmem:[#allocation14 + $0x3f8] ss:$28 sps:$4 sm:$0xff]  }
 0x324   :  { %4134 = vmatpush2.bf16.msra.mxu0 %v5701_v45  ;;  %4175 = vmatpush2.bf16.msra.mxu1 %v5704_v46  ;;  %v5757_v45 = vld [vmem:[#allocation14 + $0x44] ss:$28 sps:$4 sm:$0xff]  }
 0x325   :  { %4135 = vmatprep.subr.bf16.mxu0 %v5709_v48  ;;  %4176 = vmatprep.subr.bf16.mxu1 %v5712_v49  ;;  %v5760_v46 = vld [vmem:[#allocation14 + $0x3c4] ss:$28 sps:$4 sm:$0xff]  }
 0x326   :  { %v5755_v48 = vld [vmem:[#allocation14 + $0x40] ss:$28 sps:$4 sm:$0xff]  }
 0x327   :  { %v5758_v49 = vld [vmem:[#allocation14 + $0x3c0] ss:$28 sps:$4 sm:$0xff]  }
 0x328   :  { %4136 = vmatpush2.bf16.msra.mxu0 %v5707_v50  ;;  %4177 = vmatpush2.bf16.msra.mxu1 %v5710_v52  ;;  %v5763_v50 = vld [vmem:[#allocation14 + $0xc] ss:$28 sps:$4 sm:$0xff]  }
 0x329   :  { %4137 = vmatprep.subr.bf16.mxu0 %v5715_v53  ;;  %4178 = vmatprep.subr.bf16.mxu1 %v5718_v54  ;;  %v5766_v52 = vld [vmem:[#allocation14 + $0x38c] ss:$28 sps:$4 sm:$0xff]  }
 0x32a   :  { %v5761_v53 = vld [vmem:[#allocation14 + $0x8] ss:$28 sps:$4 sm:$0xff]  }
 0x32b   :  { %v5764_v54 = vld [vmem:[#allocation14 + $0x388] ss:$28 sps:$4 sm:$0xff]  }
 0x32c   :  { %4138 = vmatpush2.bf16.msra.mxu0 %v5713_v55  ;;  %4179 = vmatpush2.bf16.msra.mxu1 %v5716_v56  ;;  %v5769_v55 = vld [vmem:[#allocation14 + $0x354] ss:$28 sps:$4 sm:$0xff]  }
 0x32d   :  { %4189 = vmatprep.subr.bf16.mxu0 %v5721_v57  ;;  %4230 = vmatprep.subr.bf16.mxu1 %v5724_v58  ;;  %v5772_v56 = vld [vmem:[#allocation14 + $0x6d4] ss:$28 sps:$4 sm:$0xff]  }
 0x32e   :  { %v5767_v57 = vld [vmem:[#allocation14 + $0x350] ss:$28 sps:$4 sm:$0xff]  }
 0x32f   :  { %v5770_v58 = vld [vmem:[#allocation14 + $0x6d0] ss:$28 sps:$4 sm:$0xff]  }
 0x3af   :  { %v2606_v6 = vpop.f32.mrf.mxu0  ;;  %v2647_v63 = vpop.f32.mrf.mxu1 }
 0x3b0   :  { %v2607_v1 = vadd.f32 %v2606_v6, %v2395_v60  ;;  %v2648_v3 = vadd.f32 %v2647_v63, %v2403_v61  ;;  %v5778_v60 = vld [vmem:[#allocation14 + $0x69c] ss:$28 sps:$4 sm:$0xff]   ;;  %v5784_v6 = vld [vmem:[#allocation14 + $0x664] ss:$28 sps:$4 sm:$0xff]  }
 0x3b1   :  { %v2608_v4 = vpop.f32.mrf.mxu0  ;;  %v2649_v35 = vpop.f32.mrf.mxu1  ;;  %v5773_v61 = vld [vmem:[#allocation14 + $0x318] ss:$28 sps:$4 sm:$0xff]   ;;  %v5779_v63 = vld [vmem:[#allocation14 + $0x2e0] ss:$28 sps:$4 sm:$0xff]  }
 0x3b2   :  { %v2609_v5 = vadd.f32 %v2608_v4, %v2399_v62  ;;  %v2650_v8 = vadd.f32 %v2649_v35, %v2407_v47  ;;  %v2654_v16 = vmax.f32 %v2607_v1, 0.0  ;;  %v2656_v9 = vmax.f32 %v2648_v3, 0.0  ;;  %v5776_v62 = vld [vmem:[#allocation14 + $0x698] ss:$28 sps:$4 sm:$0xff]   ;;  %v5781_v47 = vld [vmem:[#allocation14 + $0x2e4] ss:$28 sps:$4 sm:$0xff]  }
 0x3b3   :  { %v2610_v10 = vpop.f32.mrf.mxu0  ;;  %v2651_v11 = vpop.f32.mrf.mxu1  ;;  %v5782_v1 = vld [vmem:[#allocation14 + $0x660] ss:$28 sps:$4 sm:$0xff]   ;;  %v5787_v3 = vld [vmem:[#allocation14 + $0x2ac] ss:$28 sps:$4 sm:$0xff]  }
 0x3b4   :  { %v2655_v12 = vmax.f32 %v2609_v5, 0.0  ;;  %v2657_v13 = vmax.f32 %v2650_v8, 0.0  ;;  %v6398_v26 = vpack.c.bf16 %v2654_v16, %v2654_v16  ;;  %v6400_v27 = vpack.c.bf16 %v2656_v9, %v2656_v9  ;;  %v5790_v4 = vld [vmem:[#allocation14 + $0x62c] ss:$28 sps:$4 sm:$0xff]   ;;  %v5793_v8 = vld [vmem:[#allocation14 + $0x274] ss:$28 sps:$4 sm:$0xff]  }
 0x3b5   :  { %v2611_v14 = vpop.f32.mrf.mxu0  ;;  %v2652_v17 = vpop.f32.mrf.mxu1  ;;  %v5785_v35 = vld [vmem:[#allocation14 + $0x2a8] ss:$28 sps:$4 sm:$0xff]   ;;  %v5796_v16 = vld [vmem:[#allocation14 + $0x5f4] ss:$28 sps:$4 sm:$0xff]   ;;  %v5799_v11 = vld [vmem:[#allocation14 + $0x23c] ss:$28 sps:$4 sm:$0xff]  }
 0x3b6   :  { %v6394_v18 = vpack.c.bf16 %v2655_v12, %v2655_v12  ;;  %v6396_v19 = vpack.c.bf16 %v2657_v13, %v2657_v13  ;;  %v5788_v5 = vld [vmem:[#allocation14 + $0x628] ss:$28 sps:$4 sm:$0xff]   ;;  %v5791_v9 = vld [vmem:[#allocation14 + $0x270] ss:$28 sps:$4 sm:$0xff]   ;;  %v5802_v12 = vld [vmem:[#allocation14 + $0x5bc] ss:$28 sps:$4 sm:$0xff]  }
 0x3b7   :  { %v5794_v10 = vld [vmem:[#allocation14 + $0x5f0] ss:$28 sps:$4 sm:$0xff]   ;;  %v5797_v13 = vld [vmem:[#allocation14 + $0x238] ss:$28 sps:$4 sm:$0xff]   ;;  %v5805_v17 = vld [vmem:[#allocation14 + $0x204] ss:$28 sps:$4 sm:$0xff]  }
 0x3b8   :  { %4139 = vmatprep.mubr.bf16.mxu0 %v6394_v18  ;;  %4180 = vmatprep.mubr.bf16.mxu1 %v6396_v19  ;;  %v5800_v14 = vld [vmem:[#allocation14 + $0x5b8] ss:$28 sps:$4 sm:$0xff]  }
 0x3b9   :  { %4140 = vmatmul.mubr.bf16.vlgmr.msra.gmra.mxu0 %v6398_v26  ;;  %4181 = vmatmul.mubr.bf16.vlgmr.msra.gmra.mxu1 %v6400_v27 }
 0x3ba   :  { %4190 = vmatpush1.bf16.msra.mxu0 %v5719_v22  ;;  %4231 = vmatpush1.bf16.msra.mxu1 %v5722_v25  ;;  %v5808_v22 = vld [vmem:[#allocation14 + $0x584] ss:$28 sps:$4 sm:$0xff]  }
 0x3bb   :  { %4221 = vmatprep.mubr.bf16.mxu0 %v6394_v18  ;;  %4262 = vmatprep.mubr.bf16.mxu1 %v6396_v19  ;;  %v5803_v25 = vld [vmem:[#allocation14 + $0x200] ss:$28 sps:$4 sm:$0xff]  }
 0x3bc   :  { %4191 = vmatprep.subr.bf16.mxu0 %v5727_v20  ;;  %4232 = vmatprep.subr.bf16.mxu1 %v5730_v21  ;;  %v5806_v20 = vld [vmem:[#allocation14 + $0x580] ss:$28 sps:$4 sm:$0xff]   ;;  %v5811_v21 = vld [vmem:[#allocation14 + $0x1cc] ss:$28 sps:$4 sm:$0xff]  }
 0x3be   :  { %4192 = vmatpush1.bf16.msra.mxu0 %v5725_v23  ;;  %4233 = vmatpush1.bf16.msra.mxu1 %v5728_v28  ;;  %v5814_v23 = vld [vmem:[#allocation14 + $0x54c] ss:$28 sps:$4 sm:$0xff]  }
 0x3bf   :  { %4193 = vmatprep.subr.bf16.mxu0 %v5733_v24  ;;  %4234 = vmatprep.subr.bf16.mxu1 %v5736_v29  ;;  %v5809_v28 = vld [vmem:[#allocation14 + $0x1c8] ss:$28 sps:$4 sm:$0xff]   ;;  %v5817_v29 = vld [vmem:[#allocation14 + $0x19c] ss:$28 sps:$4 sm:$0xff]  }
 0x3c0   :  { %v5812_v24 = vld [vmem:[#allocation14 + $0x548] ss:$28 sps:$4 sm:$0xff]  }
 0x3c2   :  { %4194 = vmatpush1.bf16.msra.mxu0 %v5731_v30  ;;  %4235 = vmatpush1.bf16.msra.mxu1 %v5734_v31  ;;  %v5820_v30 = vld [vmem:[#allocation14 + $0x51c] ss:$28 sps:$4 sm:$0xff]  }
 0x3c3   :  { %4195 = vmatprep.subr.bf16.mxu0 %v5739_v32  ;;  %4236 = vmatprep.subr.bf16.mxu1 %v5742_v33  ;;  %v5815_v31 = vld [vmem:[#allocation14 + $0x198] ss:$28 sps:$4 sm:$0xff]   ;;  %v5823_v33 = vld [vmem:[#allocation14 + $0x164] ss:$28 sps:$4 sm:$0xff]  }
 0x3c4   :  { %v5818_v32 = vld [vmem:[#allocation14 + $0x518] ss:$28 sps:$4 sm:$0xff]  }
 0x3c6   :  { %4196 = vmatpush1.bf16.msra.mxu0 %v5737_v51  ;;  %4237 = vmatpush1.bf16.msra.mxu1 %v5740_v36  ;;  %v5826_v51 = vld [vmem:[#allocation14 + $0x4e4] ss:$28 sps:$4 sm:$0xff]  }
 0x3c7   :  { %4197 = vmatprep.subr.bf16.mxu0 %v5745_v37  ;;  %4238 = vmatprep.subr.bf16.mxu1 %v5748_v38  ;;  %v5821_v36 = vld [vmem:[#allocation14 + $0x160] ss:$28 sps:$4 sm:$0xff]   ;;  %v5829_v38 = vld [vmem:[#allocation14 + $0x12c] ss:$28 sps:$4 sm:$0xff]  }
 0x3c8   :  { %v5824_v37 = vld [vmem:[#allocation14 + $0x4e0] ss:$28 sps:$4 sm:$0xff]  }
 0x3ca   :  { %4198 = vmatpush1.bf16.msra.mxu0 %v5743_v39  ;;  %4239 = vmatpush1.bf16.msra.mxu1 %v5746_v40  ;;  %v5832_v39 = vld [vmem:[#allocation14 + $0x4ac] ss:$28 sps:$4 sm:$0xff]  }
 0x3cb   :  { %4199 = vmatprep.subr.bf16.mxu0 %v5751_v41  ;;  %4240 = vmatprep.subr.bf16.mxu1 %v5754_v42  ;;  %v5827_v40 = vld [vmem:[#allocation14 + $0x128] ss:$28 sps:$4 sm:$0xff]   ;;  %v5835_v42 = vld [vmem:[#allocation14 + $0xf4] ss:$28 sps:$4 sm:$0xff]  }
 0x3cc   :  { %v5830_v41 = vld [vmem:[#allocation14 + $0x4a8] ss:$28 sps:$4 sm:$0xff]  }
 0x3ce   :  { %4200 = vmatpush1.bf16.msra.mxu0 %v5749_v43  ;;  %4241 = vmatpush1.bf16.msra.mxu1 %v5752_v44  ;;  %v5838_v43 = vld [vmem:[#allocation14 + $0x474] ss:$28 sps:$4 sm:$0xff]  }
 0x3cf   :  { %4201 = vmatprep.subr.bf16.mxu0 %v5757_v45  ;;  %4242 = vmatprep.subr.bf16.mxu1 %v5760_v46  ;;  %v5833_v44 = vld [vmem:[#allocation14 + $0xf0] ss:$28 sps:$4 sm:$0xff]   ;;  %v5841_v46 = vld [vmem:[#allocation14 + $0xbc] ss:$28 sps:$4 sm:$0xff]  }
 0x3d0   :  { %v5836_v45 = vld [vmem:[#allocation14 + $0x470] ss:$28 sps:$4 sm:$0xff]  }
 0x3d2   :  { %4202 = vmatpush1.bf16.msra.mxu0 %v5755_v48  ;;  %4243 = vmatpush1.bf16.msra.mxu1 %v5758_v49  ;;  %v5844_v48 = vld [vmem:[#allocation14 + $0x43c] ss:$28 sps:$4 sm:$0xff]  }
 0x3d3   :  { %4203 = vmatprep.subr.bf16.mxu0 %v5763_v50  ;;  %4244 = vmatprep.subr.bf16.mxu1 %v5766_v52  ;;  %v5839_v49 = vld [vmem:[#allocation14 + $0xb8] ss:$28 sps:$4 sm:$0xff]   ;;  %v5847_v52 = vld [vmem:[#allocation14 + $0x84] ss:$28 sps:$4 sm:$0xff]  }
 0x3d4   :  { %v5842_v50 = vld [vmem:[#allocation14 + $0x438] ss:$28 sps:$4 sm:$0xff]  }
 0x3d6   :  { %4204 = vmatpush1.bf16.msra.mxu0 %v5761_v53  ;;  %4245 = vmatpush1.bf16.msra.mxu1 %v5764_v54  ;;  %v5850_v53 = vld [vmem:[#allocation14 + $0x404] ss:$28 sps:$4 sm:$0xff]  }
 0x3d7   :  { %4205 = vmatprep.subr.bf16.mxu0 %v5769_v55  ;;  %4246 = vmatprep.subr.bf16.mxu1 %v5772_v56  ;;  %v5845_v54 = vld [vmem:[#allocation14 + $0x80] ss:$28 sps:$4 sm:$0xff]   ;;  %v5853_v56 = vld [vmem:[#allocation14 + $0x4c] ss:$28 sps:$4 sm:$0xff]  }
 0x3d8   :  { %v5848_v55 = vld [vmem:[#allocation14 + $0x400] ss:$28 sps:$4 sm:$0xff]  }
 0x3da   :  { %4206 = vmatpush2.bf16.msra.mxu0 %v5767_v57  ;;  %4247 = vmatpush2.bf16.msra.mxu1 %v5770_v58  ;;  %v5856_v57 = vld [vmem:[#allocation14 + $0x3cc] ss:$28 sps:$4 sm:$0xff]  }
 0x3db   :  { %4207 = vmatprep.subr.bf16.mxu0 %v5775_v59  ;;  %4248 = vmatprep.subr.bf16.mxu1 %v5778_v60  ;;  %v5851_v58 = vld [vmem:[#allocation14 + $0x48] ss:$28 sps:$4 sm:$0xff]   ;;  %v5859_v60 = vld [vmem:[#allocation14 + $0x14] ss:$28 sps:$4 sm:$0xff]  }
 0x3dc   :  { %v5854_v59 = vld [vmem:[#allocation14 + $0x3c8] ss:$28 sps:$4 sm:$0xff]  }
 0x3de   :  { %4208 = vmatpush2.bf16.msra.mxu0 %v5773_v61  ;;  %4249 = vmatpush2.bf16.msra.mxu1 %v5776_v62  ;;  %v5862_v61 = vld [vmem:[#allocation14 + $0x394] ss:$28 sps:$4 sm:$0xff]  }
 0x3df   :  { %4209 = vmatprep.subr.bf16.mxu0 %v5781_v47  ;;  %4250 = vmatprep.subr.bf16.mxu1 %v5784_v6  ;;  %v5857_v62 = vld [vmem:[#allocation14 + $0x10] ss:$28 sps:$4 sm:$0xff]   ;;  %v5865_v6 = vld [vmem:[#allocation14 + $0x35c] ss:$28 sps:$4 sm:$0xff]  }
 0x3e0   :  { %v5860_v47 = vld [vmem:[#allocation14 + $0x390] ss:$28 sps:$4 sm:$0xff]  }
 0x3e2   :  { %4210 = vmatpush2.bf16.msra.mxu0 %v5779_v63  ;;  %4251 = vmatpush2.bf16.msra.mxu1 %v5782_v1  ;;  %v5868_v63 = vld [vmem:[#allocation14 + $0x6dc] ss:$28 sps:$4 sm:$0xff]  }
 0x3e3   :  { %4211 = vmatprep.subr.bf16.mxu0 %v5787_v3  ;;  %4252 = vmatprep.subr.bf16.mxu1 %v5790_v4  ;;  %v5863_v1 = vld [vmem:[#allocation14 + $0x358] ss:$28 sps:$4 sm:$0xff]   ;;  %v5871_v4 = vld [vmem:[#allocation14 + $0x324] ss:$28 sps:$4 sm:$0xff]  }
 0x3e4   :  { %v5866_v3 = vld [vmem:[#allocation14 + $0x6d8] ss:$28 sps:$4 sm:$0xff]  }
 0x3e6   :  { %4212 = vmatpush2.bf16.msra.mxu0 %v5785_v35  ;;  %4253 = vmatpush2.bf16.msra.mxu1 %v5788_v5  ;;  %v5874_v35 = vld [vmem:[#allocation14 + $0x6a4] ss:$28 sps:$4 sm:$0xff]  }
 0x3e7   :  { %4213 = vmatprep.subr.bf16.mxu0 %v5793_v8  ;;  %4254 = vmatprep.subr.bf16.mxu1 %v5796_v16  ;;  %v5869_v5 = vld [vmem:[#allocation14 + $0x320] ss:$28 sps:$4 sm:$0xff]   ;;  %v5877_v16 = vld [vmem:[#allocation14 + $0x2ec] ss:$28 sps:$4 sm:$0xff]  }
 0x3e8   :  { %v5872_v8 = vld [vmem:[#allocation14 + $0x6a0] ss:$28 sps:$4 sm:$0xff]  }
 0x3ea   :  { %4214 = vmatpush2.bf16.msra.mxu0 %v5791_v9  ;;  %4255 = vmatpush2.bf16.msra.mxu1 %v5794_v10  ;;  %v5880_v9 = vld [vmem:[#allocation14 + $0x66c] ss:$28 sps:$4 sm:$0xff]  }
 0x3eb   :  { %4215 = vmatprep.subr.bf16.mxu0 %v5799_v11  ;;  %4256 = vmatprep.subr.bf16.mxu1 %v5802_v12  ;;  %v5875_v10 = vld [vmem:[#allocation14 + $0x2e8] ss:$28 sps:$4 sm:$0xff]   ;;  %v5883_v12 = vld [vmem:[#allocation14 + $0x2b4] ss:$28 sps:$4 sm:$0xff]  }
 0x3ec   :  { %v5878_v11 = vld [vmem:[#allocation14 + $0x668] ss:$28 sps:$4 sm:$0xff]  }
 0x3ee   :  { %4216 = vmatpush2.bf16.msra.mxu0 %v5797_v13  ;;  %4257 = vmatpush2.bf16.msra.mxu1 %v5800_v14  ;;  %v5886_v13 = vld [vmem:[#allocation14 + $0x634] ss:$28 sps:$4 sm:$0xff]  }
 0x3ef   :  { %4217 = vmatprep.subr.bf16.mxu0 %v5805_v17  ;;  %4258 = vmatprep.subr.bf16.mxu1 %v5808_v22  ;;  %v5881_v14 = vld [vmem:[#allocation14 + $0x2b0] ss:$28 sps:$4 sm:$0xff]   ;;  %v5889_v22 = vld [vmem:[#allocation14 + $0x27c] ss:$28 sps:$4 sm:$0xff]  }
 0x3f0   :  { %v5884_v17 = vld [vmem:[#allocation14 + $0x630] ss:$28 sps:$4 sm:$0xff]  }
 0x3f2   :  { %4218 = vmatpush2.bf16.msra.mxu0 %v5803_v25  ;;  %4259 = vmatpush2.bf16.msra.mxu1 %v5806_v20  ;;  %v5892_v25 = vld [vmem:[#allocation14 + $0x5fc] ss:$28 sps:$4 sm:$0xff]  }
 0x3f3   :  { %4219 = vmatprep.subr.bf16.mxu0 %v5811_v21  ;;  %4260 = vmatprep.subr.bf16.mxu1 %v5814_v23  ;;  %v5887_v20 = vld [vmem:[#allocation14 + $0x278] ss:$28 sps:$4 sm:$0xff]   ;;  %v5895_v23 = vld [vmem:[#allocation14 + $0x244] ss:$28 sps:$4 sm:$0xff]  }
 0x3f4   :  { %v5890_v21 = vld [vmem:[#allocation14 + $0x5f8] ss:$28 sps:$4 sm:$0xff]  }
 0x3f6   :  { %4220 = vmatpush2.bf16.msra.mxu0 %v5809_v28  ;;  %4261 = vmatpush2.bf16.msra.mxu1 %v5812_v24  ;;  %v5898_v28 = vld [vmem:[#allocation14 + $0x5c4] ss:$28 sps:$4 sm:$0xff]  }
 0x3f7   :  { %4271 = vmatprep.subr.bf16.mxu0 %v5817_v29  ;;  %4312 = vmatprep.subr.bf16.mxu1 %v5820_v30  ;;  %v5893_v24 = vld [vmem:[#allocation14 + $0x240] ss:$28 sps:$4 sm:$0xff]   ;;  %v5901_v30 = vld [vmem:[#allocation14 + $0x20c] ss:$28 sps:$4 sm:$0xff]  }
 0x3f8   :  { %v5896_v29 = vld [vmem:[#allocation14 + $0x5c0] ss:$28 sps:$4 sm:$0xff]  }
 0x3f9   :  { %4222 = vmatmul.mubr.bf16.vlgmr.msra.gmra.mxu0 %v6398_v26  ;;  %4263 = vmatmul.mubr.bf16.vlgmr.msra.gmra.mxu1 %v6400_v27 }
 0x3fa   :  { %4272 = vmatpush1.bf16.msra.mxu0 %v5815_v31  ;;  %4303 = vmatprep.mubr.bf16.mxu0 %v6394_v18  ;;  %v5904_v31 = vld [vmem:[#allocation14 + $0x58c] ss:$28 sps:$4 sm:$0xff]  }
 0x3fb   :  { %4313 = vmatpush1.bf16.msra.mxu1 %v5818_v32  ;;  %4344 = vmatprep.mubr.bf16.mxu1 %v6396_v19  ;;  %v5899_v32 = vld [vmem:[#allocation14 + $0x208] ss:$28 sps:$4 sm:$0xff]  }
 0x3fc   :  { %4273 = vmatprep.subr.bf16.mxu0 %v5823_v33  ;;  %4314 = vmatprep.subr.bf16.mxu1 %v5826_v51  ;;  %v5902_v33 = vld [vmem:[#allocation14 + $0x588] ss:$28 sps:$4 sm:$0xff]   ;;  %v5907_v51 = vld [vmem:[#allocation14 + $0x1d4] ss:$28 sps:$4 sm:$0xff]  }
 0x3fe   :  { %4274 = vmatpush1.bf16.msra.mxu0 %v5821_v36  ;;  %v5910_v36 = vld [vmem:[#allocation14 + $0x554] ss:$28 sps:$4 sm:$0xff]  }
 0x3ff   :  { %4315 = vmatpush1.bf16.msra.mxu1 %v5824_v37  ;;  %4275 = vmatprep.subr.bf16.mxu0 %v5829_v38  ;;  %v5905_v37 = vld [vmem:[#allocation14 + $0x1d0] ss:$28 sps:$4 sm:$0xff]  }
 0x400   :  { %4316 = vmatprep.subr.bf16.mxu1 %v5832_v39  ;;  %v5908_v38 = vld [vmem:[#allocation14 + $0x550] ss:$28 sps:$4 sm:$0xff]   ;;  %v5911_v39 = vld [vmem:[#allocation14 + $0x360] ss:$28 sps:$4 sm:$0xff]  }
 0x402   :  { %4276 = vmatpush1.bf16.msra.mxu0 %v5827_v40  ;;  %v5912_v40 = vld [vmem:[#allocation14 + $0x6e0] ss:$28 sps:$4 sm:$0xff]  }
 0x403   :  { %4317 = vmatpush1.bf16.msra.mxu1 %v5830_v41  ;;  %4277 = vmatprep.subr.bf16.mxu0 %v5835_v42  ;;  %v5913_v41 = vld [vmem:[#allocation14 + $0x1a0] ss:$28 sps:$4 sm:$0xff]  }
 0x404   :  { %4318 = vmatprep.subr.bf16.mxu1 %v5838_v43  ;;  %v5914_v42 = vld [vmem:[#allocation14 + $0x520] ss:$28 sps:$4 sm:$0xff]   ;;  %v5915_v43 = vld [vmem:[#allocation14 + $0x328] ss:$28 sps:$4 sm:$0xff]  }
 0x406   :  { %4278 = vmatpush1.bf16.msra.mxu0 %v5833_v44  ;;  %v5916_v44 = vld [vmem:[#allocation14 + $0x6a8] ss:$28 sps:$4 sm:$0xff]  }
 0x407   :  { %4319 = vmatpush1.bf16.msra.mxu1 %v5836_v45  ;;  %4279 = vmatprep.subr.bf16.mxu0 %v5841_v46  ;;  %v5917_v45 = vld [vmem:[#allocation14 + $0x168] ss:$28 sps:$4 sm:$0xff]  }
 0x408   :  { %4320 = vmatprep.subr.bf16.mxu1 %v5844_v48  ;;  %v5918_v46 = vld [vmem:[#allocation14 + $0x4e8] ss:$28 sps:$4 sm:$0xff]   ;;  %v5919_v48 = vld [vmem:[#allocation14 + $0x2f0] ss:$28 sps:$4 sm:$0xff]  }
 0x40a   :  { %4280 = vmatpush1.bf16.msra.mxu0 %v5839_v49  ;;  %v5920_v49 = vld [vmem:[#allocation14 + $0x670] ss:$28 sps:$4 sm:$0xff]  }
 0x40b   :  { %4321 = vmatpush1.bf16.msra.mxu1 %v5842_v50  ;;  %4281 = vmatprep.subr.bf16.mxu0 %v5847_v52  ;;  %v5921_v50 = vld [vmem:[#allocation14 + $0x130] ss:$28 sps:$4 sm:$0xff]  }
 0x40c   :  { %4322 = vmatprep.subr.bf16.mxu1 %v5850_v53  ;;  %v5922_v52 = vld [vmem:[#allocation14 + $0x4b0] ss:$28 sps:$4 sm:$0xff]   ;;  %v5923_v53 = vld [vmem:[#allocation14 + $0x2b8] ss:$28 sps:$4 sm:$0xff]  }
 0x40e   :  { %4282 = vmatpush1.bf16.msra.mxu0 %v5845_v54  ;;  %v5924_v54 = vld [vmem:[#allocation14 + $0x638] ss:$28 sps:$4 sm:$0xff]  }
 0x40f   :  { %4323 = vmatpush1.bf16.msra.mxu1 %v5848_v55  ;;  %4283 = vmatprep.subr.bf16.mxu0 %v5853_v56  ;;  %v5925_v55 = vld [vmem:[#allocation14 + $0xf8] ss:$28 sps:$4 sm:$0xff]   ;;  %v5927_v56 = vld [vmem:[#allocation14 + $0x280] ss:$28 sps:$4 sm:$0xff]  }
 0x410   :  { %4324 = vmatprep.subr.bf16.mxu1 %v5856_v57  ;;  %v5928_v57 = vld [vmem:[#allocation14 + $0x600] ss:$28 sps:$4 sm:$0xff]  }
 0x412   :  { %4284 = vmatpush1.bf16.msra.mxu0 %v5851_v58  ;;  %v5930_v58 = vld [vmem:[#allocation14 + $0x440] ss:$28 sps:$4 sm:$0xff]  }
 0x413   :  { %4325 = vmatpush1.bf16.msra.mxu1 %v5854_v59  ;;  %4285 = vmatprep.subr.bf16.mxu0 %v5859_v60  ;;  %v5931_v59 = vld [vmem:[#allocation14 + $0x248] ss:$28 sps:$4 sm:$0xff]  }
 0x414   :  { %4326 = vmatprep.subr.bf16.mxu1 %v5862_v61  ;;  %v5932_v60 = vld [vmem:[#allocation14 + $0x5c8] ss:$28 sps:$4 sm:$0xff]  }
 0x415   :  { %v5933_v61 = vld [vmem:[#allocation14 + $0x88] ss:$28 sps:$4 sm:$0xff]  }
 0x416   :  { %4286 = vmatpush1.bf16.msra.mxu0 %v5857_v62  ;;  %v5934_v62 = vld [vmem:[#allocation14 + $0x408] ss:$28 sps:$4 sm:$0xff]  }
 0x417   :  { %4327 = vmatpush1.bf16.msra.mxu1 %v5860_v47  ;;  %4287 = vmatprep.subr.bf16.mxu0 %v5865_v6  ;;  %v5935_v47 = vld [vmem:[#allocation14 + $0x210] ss:$28 sps:$4 sm:$0xff]  }
 0x418   :  { %4328 = vmatprep.subr.bf16.mxu1 %v5868_v63  ;;  %v5936_v6 = vld [vmem:[#allocation14 + $0x590] ss:$28 sps:$4 sm:$0xff]  }
 0x419   :  { %v5937_v63 = vld [vmem:[#allocation14 + $0x50] ss:$28 sps:$4 sm:$0xff]  }
 0x41a   :  { %4288 = vmatpush2.bf16.msra.mxu0 %v5863_v1  ;;  %v5938_v1 = vld [vmem:[#allocation14 + $0x3d0] ss:$28 sps:$4 sm:$0xff]  }
 0x41b   :  { %4329 = vmatpush2.bf16.msra.mxu1 %v5866_v3  ;;  %4289 = vmatprep.subr.bf16.mxu0 %v5871_v4  ;;  %v5939_v3 = vld [vmem:[#allocation14 + $0x1d8] ss:$28 sps:$4 sm:$0xff]  }
 0x41c   :  { %4330 = vmatprep.subr.bf16.mxu1 %v5874_v35  ;;  %v5940_v4 = vld [vmem:[#allocation14 + $0x558] ss:$28 sps:$4 sm:$0xff]  }
 0x41d   :  { %v5941_v35 = vld [vmem:[#allocation14 + $0x18] ss:$28 sps:$4 sm:$0xff]  }
 0x41e   :  { %4290 = vmatpush2.bf16.msra.mxu0 %v5869_v5  ;;  %v5942_v5 = vld [vmem:[#allocation14 + $0x398] ss:$28 sps:$4 sm:$0xff]  }
 0x41f   :  { %4331 = vmatpush2.bf16.msra.mxu1 %v5872_v8  ;;  %4291 = vmatprep.subr.bf16.mxu0 %v5877_v16  ;;  %v6421_v8 = vld [vmem:[%s6454_s8] sm:$0xff]  ;;  %s6223_s8 = smov [#allocation17]  }
 0x420   :  { %4332 = vmatprep.subr.bf16.mxu1 %v5880_v9  ;;  %v2923_v16 = vrot.slane %v6421_v8, %v6364_v0  ;;  %v2927_v9 = vrot.slane %v6421_v8, %v6367_v2  ;;  %s4493_s26 = sshll.u32 %s6223_s8, 4  ;;  %s4494_s26 = int_to_ptr.vmem [resolvable:$true] %s4493_s26 }
 0x421   :  { %s6134_s27 = scalar_lea.vmem %s4494_s26, 128  ;;  %p6139_p13 = scmp.lt.s32.totalorder %s4494_s26, %s4494_s26 }
 0x422   :  { %4292 = vmatpush2.bf16.msra.mxu0 %v5875_v10  ;;  %p6135_p12 = scmp.ne.s32.totalorder %s4494_s26, %s6134_s27  ;;  %p6140_p0 = scmp.lt.s32.totalorder %s6134_s27, %s6134_s27 }
 0x423   :  { %4333 = vmatpush2.bf16.msra.mxu1 %v5878_v11  ;;  %4293 = vmatprep.subr.bf16.mxu0 %v5883_v12 }
 0x424   :  { %4334 = vmatprep.subr.bf16.mxu1 %v5886_v13  ;;  %p6141_p1 = por %p6140_p0, %p6139_p13 }
 0x426   :  { %4294 = vmatpush2.bf16.msra.mxu0 %v5881_v14  ;;  %p6142_p2 = pnand %p6141_p1, %p6135_p12 }
 0x427   :  { %4335 = vmatpush2.bf16.msra.mxu1 %v5884_v17  ;;  %4295 = vmatprep.subr.bf16.mxu0 %v5889_v22 }
 0x428   :  { %4336 = vmatprep.subr.bf16.mxu1 %v5892_v25 }
 0x42a   :  { %4296 = vmatpush2.bf16.msra.mxu0 %v5887_v20 }
 0x42b   :  { %4337 = vmatpush2.bf16.msra.mxu1 %v5890_v21  ;;  %4297 = vmatprep.subr.bf16.mxu0 %v5895_v23 }
 0x42c   :  { %4338 = vmatprep.subr.bf16.mxu1 %v5898_v28 }
 0x42e   :  { %4298 = vmatpush2.bf16.msra.mxu0 %v5893_v24 }
 0x42f   :  { %4339 = vmatpush2.bf16.msra.mxu1 %v5896_v29  ;;  %4299 = vmatprep.subr.bf16.mxu0 %v5901_v30 }
 0x430   :  { %4340 = vmatprep.subr.bf16.mxu1 %v5904_v31 }
 0x432   :  { %4300 = vmatpush2.bf16.msra.mxu0 %v5899_v32 }
 0x433   :  { %4341 = vmatpush2.bf16.msra.mxu1 %v5902_v33  ;;  %4301 = vmatprep.subr.bf16.mxu0 %v5907_v51  ;;  %v2931_v51 = vrot.slane %v6421_v8, %v6377_v7 }
 0x434   :  { %4342 = vmatprep.subr.bf16.mxu1 %v5910_v36  ;;  %v2935_v36 = vrot.slane %v6421_v8, %v6380_v34 }
 0x436   :  { %4302 = vmatpush2.bf16.msra.mxu0 %v5905_v37 }
 0x437   :  { %4343 = vmatpush2.bf16.msra.mxu1 %v5908_v38  ;;  %5074 = vmatprep.subr.bf16.mxu0 %v5911_v39 }
 0x438   :  { %5096 = vmatprep.subr.bf16.mxu1 %v5912_v40 }
 0x439   :  { %4304 = vmatmul.mubr.bf16.vlgmr.msra.gmra.mxu0 %v6398_v26 }
 0x43a   :  { %4345 = vmatmul.mubr.bf16.vlgmr.msra.gmra.mxu1 %v6400_v27  ;;  %5075 = vmatpush3.bf16.msra.mxu0 %v5913_v41 }
 0x43b   :  { %4385 = vmatprep.mubr.bf16.mxu0 %v6394_v18  ;;  %5097 = vmatpush3.bf16.msra.mxu1 %v5914_v42  ;;  %v5926_v18 = vld [vmem:[#allocation14 + $0x478] ss:$28 sps:$4 sm:$0xff]  }
 0x43c   :  { %4425 = vmatprep.mubr.bf16.mxu1 %v6396_v19  ;;  %5076 = vmatprep.subr.bf16.mxu0 %v5915_v43  ;;  %v5929_v19 = vld [vmem:[#allocation14 + $0xc0] ss:$28 sps:$4 sm:$0xff]  }
 0x43d   :  { %5098 = vmatprep.subr.bf16.mxu1 %v5916_v44 }
 0x43e   :  { %5077 = vmatpush3.bf16.msra.mxu0 %v5917_v45 }
 0x43f   :  { %5099 = vmatpush3.bf16.msra.mxu1 %v5918_v46  ;;  %5078 = vmatprep.subr.bf16.mxu0 %v5919_v48 }
 0x440   :  { %5100 = vmatprep.subr.bf16.mxu1 %v5920_v49 }
 0x442   :  { %5079 = vmatpush3.bf16.msra.mxu0 %v5921_v50 }
 0x443   :  { %5101 = vmatpush3.bf16.msra.mxu1 %v5922_v52  ;;  %5080 = vmatprep.subr.bf16.mxu0 %v5923_v53 }
 0x444   :  { %5102 = vmatprep.subr.bf16.mxu1 %v5924_v54 }
 0x446   :  { %5081 = vmatpush3.bf16.msra.mxu0 %v5925_v55 }
 0x447   :  { %5103 = vmatpush3.bf16.msra.mxu1 %v5926_v18  ;;  %5082 = vmatprep.subr.bf16.mxu0 %v5927_v56 }
 0x448   :  { %5104 = vmatprep.subr.bf16.mxu1 %v5928_v57 }
 0x44a   :  { %5083 = vmatpush3.bf16.msra.mxu0 %v5929_v19 }
 0x44b   :  { %5105 = vmatpush3.bf16.msra.mxu1 %v5930_v58  ;;  %5084 = vmatprep.subr.bf16.mxu0 %v5931_v59 }
 0x44c   :  { %5106 = vmatprep.subr.bf16.mxu1 %v5932_v60 }
 0x44e   :  { %5085 = vmatpush3.bf16.msra.mxu0 %v5933_v61 }
 0x44f   :  { %5107 = vmatpush3.bf16.msra.mxu1 %v5934_v62  ;;  %5086 = vmatprep.subr.bf16.mxu0 %v5935_v47 }
 0x450   :  { %5108 = vmatprep.subr.bf16.mxu1 %v5936_v6 }
 0x452   :  { %5087 = vmatpush3.bf16.msra.mxu0 %v5937_v63 }
 0x453   :  { %5109 = vmatpush3.bf16.msra.mxu1 %v5938_v1  ;;  %5088 = vmatprep.subr.bf16.mxu0 %v5939_v3 }
 0x454   :  { %5110 = vmatprep.subr.bf16.mxu1 %v5940_v4 }
 0x456   :  { %5089 = vmatpush3.bf16.msra.mxu0 %v5941_v35 }
 0x457   :  { %5111 = vmatpush3.bf16.msra.mxu1 %v5942_v5 }
 0x459   :  { %4386 = vmatmul.mubr.bf16.vlgmr.msra.gmra.mxu0 %v6398_v26 }
 0x45a   :  { %4426 = vmatmul.mubr.bf16.vlgmr.msra.gmra.mxu1 %v6400_v27 }
 0x479   :  { %v4141_v10 = vpop.f32.mrf.mxu0  ;;  %v4182_v11 = vpop.f32.mrf.mxu1 }
 0x47a   :  { %v4142_v12 = vadd.f32 %v4141_v10, %v2923_v16 }
 0x47b   :  { %v4143_v13 = vpop.f32.mrf.mxu0  ;;  %v4184_v14 = vpop.f32.mrf.mxu1 }
 0x47c   :  { %v4183_v17 = vadd.f32 %v4182_v11, %v4142_v12  ;;  %v4144_v26 = vadd.f32 %v4143_v13, %v2927_v9 }
 0x47d   :  { %v4145_v22 = vpop.f32.mrf.mxu0  ;;  %v4186_v27 = vpop.f32.mrf.mxu1 }
 0x47e   :  { %v4433_v25 = vsub.f32 0.0, %v4183_v17  ;;  %v4185_v20 = vadd.f32 %v4184_v14, %v4144_v26 }
 0x47f   :  { %v4146_v21 = vpop.f32.mrf.mxu0  ;;  %v4187_v23 = vpop.f32.mrf.mxu1 }
 0x480   :  { %v4440_v28 = vmul.f32 1.442695, %v4433_v25  ;;  %v4434_v24 = vsub.f32 0.0, %v4185_v20 }
 0x482   :  { %5945 = vpow2.f32 %v4440_v28  ;;  %v4442_v0 = vmul.f32 1.442695, %v4434_v24 }
 0x484   :  { %5947 = vpow2.f32 %v4442_v0 }
 0x48f   :  { %v5946_v29 = vpop.eup %5945 }
 0x490   :  { %v4454_v2 = vadd.f32 1.0, %v5946_v29 }
 0x491   :  { %v5948_v30 = vpop.eup %5947 }
 0x492   :  { %5949 = vrcp.f32 %v4454_v2  ;;  %v4455_v31 = vadd.f32 1.0, %v5948_v30 }
 0x494   :  { %5951 = vrcp.f32 %v4455_v31 }
 0x49f   :  { %v5950_v32 = vpop.eup %5949 }
 0x4a0   :  { %4468 = vst [vmem:[#allocation16] sm:$0xff] %v5950_v32 }
 0x4a1   :  { %v5952_v33 = vpop.eup %5951 }
 0x4a2   :  { %4469 = vst [vmem:[#allocation16 + $0x8] sm:$0xff] %v5952_v33 }
 0x4b9   :  { %v4223_v37 = vpop.f32.mrf.mxu0  ;;  %v4264_v38 = vpop.f32.mrf.mxu1 }
 0x4ba   :  { %v4224_v39 = vadd.f32 %v4223_v37, %v2931_v51 }
 0x4bb   :  { %v4225_v40 = vpop.f32.mrf.mxu0  ;;  %v4266_v41 = vpop.f32.mrf.mxu1 }
 0x4bc   :  { %v4265_v42 = vadd.f32 %v4264_v38, %v4224_v39  ;;  %v4226_v43 = vadd.f32 %v4225_v40, %v2935_v36 }
 0x4bd   :  { %v4227_v44 = vpop.f32.mrf.mxu0  ;;  %v4268_v45 = vpop.f32.mrf.mxu1 }
 0x4be   :  { %v4435_v46 = vsub.f32 0.0, %v4265_v42  ;;  %v4267_v48 = vadd.f32 %v4266_v41, %v4226_v43 }
 0x4bf   :  { %v4228_v49 = vpop.f32.mrf.mxu0  ;;  %v4269_v50 = vpop.f32.mrf.mxu1 }
 0x4c0   :  { %v4444_v52 = vmul.f32 1.442695, %v4435_v46  ;;  %v4436_v53 = vsub.f32 0.0, %v4267_v48 }
 0x4c2   :  { %5953 = vpow2.f32 %v4444_v52  ;;  %v4446_v7 = vmul.f32 1.442695, %v4436_v53 }
 0x4c4   :  { %5955 = vpow2.f32 %v4446_v7 }
 0x4c5   :  { %6145 = shalt.err (!%p6142_p2)
}
 0x4c6   :  { %4496 = dma.vmem_to_hbm [thread:$0]  %s4494_s26, 128, %s6457_s11, [#allocation18]  }
 0x4c7   :  { %s6224_s30 = smov [#allocation19]  }
 0x4c8   :  { %s4503_s13 = sshll.u32 %s6224_s30, 4  ;;  %s4504_s13 = int_to_ptr.vmem [resolvable:$true] %s4503_s13 }
 0x4c9   :  { %s6154_s5 = scalar_lea.vmem %s4504_s13, 128  ;;  %p6159_p4 = scmp.lt.s32.totalorder %s4504_s13, %s4504_s13 }
 0x4ca   :  { %p6155_p3 = scmp.ne.s32.totalorder %s4504_s13, %s6154_s5  ;;  %p6160_p5 = scmp.lt.s32.totalorder %s6154_s5, %s6154_s5 }
 0x4cc   :  { %p6161_p6 = por %p6160_p5, %p6159_p4 }
 0x4ce   :  { %p6162_p7 = pnand %p6161_p6, %p6155_p3 }
 0x4d0   :  { %6165 = shalt.err (!%p6162_p7)
}
 0x4d1   :  { %4506 = dma.vmem_to_hbm [thread:$0]  %s4504_s13, 128, %s6458_s12, [#allocation18]   ;;  %v5954_v34 = vpop.eup %5953  ;;  %v2938_v19 = vsub.s32 4, %v6361_v15  ;;  %v2942_v58 = vsub.s32 5, %v6361_v15  ;;  %v2946_v27 = vsub.s32 6, %v6361_v15 }
 0x4d2   :  { %v4456_v54 = vadd.f32 1.0, %v5954_v34  ;;  %v5956_v55 = vpop.eup %5955  ;;  %s6225_s11 = smov [#allocation16]  }
 0x4d3   :  { %v4457_v18 = vadd.f32 1.0, %v5956_v55  ;;  %v2939_v59 = vrot.slane %v6421_v8, %v2938_v19  ;;  %v2943_v60 = vrot.slane %v6421_v8, %v2942_v58  ;;  %v2947_v21 = vrot.slane %v6421_v8, %v2946_v27  ;;  %s4483_s12 = sshll.u32 %s6225_s11, 4  ;;  %s4484_s12 = int_to_ptr.vmem [resolvable:$true] %s4483_s12 }
 0x4d4   :  { %5957 = vrcp.f32 %v4456_v54  ;;  %s6174_s0 = scalar_lea.vmem %s4484_s12, 896  ;;  %p6179_p9 = scmp.lt.s32.totalorder %s4484_s12, %s4484_s12 }
 0x4d5   :  { %5959 = vrcp.f32 %v4457_v18  ;;  %p6175_p8 = scmp.ne.s32.totalorder %s4484_s12, %s6174_s0  ;;  %p6180_p10 = scmp.lt.s32.totalorder %s6174_s0, %s6174_s0 }
 0x4d7   :  { %p6181_p11 = por %p6180_p10, %p6179_p9 }
 0x4d9   :  { %p6182_p12 = pnand %p6181_p11, %p6175_p8 }
 0x4e1   :  { %v5958_v56 = vpop.eup %5957 }
 0x4e2   :  { %4470 = vst [vmem:[#allocation16 + $0x10] sm:$0xff] %v5958_v56  ;;  %v5960_v57 = vpop.eup %5959 }
 0x4e3   :  { %4471 = vst [vmem:[#allocation16 + $0x18] sm:$0xff] %v5960_v57 }
 0x4f9   :  { %v4305_v61 = vpop.f32.mrf.mxu0 }
 0x4fa   :  { %v4306_v62 = vadd.f32 %v4305_v61, %v2939_v59  ;;  %v4346_v47 = vpop.f32.mrf.mxu1 }
 0x4fb   :  { %v4307_v6 = vpop.f32.mrf.mxu0 }
 0x4fc   :  { %v4347_v63 = vadd.f32 %v4346_v47, %v4306_v62  ;;  %v4308_v1 = vadd.f32 %v4307_v6, %v2943_v60  ;;  %v4348_v3 = vpop.f32.mrf.mxu1 }
 0x4fd   :  { %v4309_v4 = vpop.f32.mrf.mxu0 }
 0x4fe   :  { %v4437_v35 = vsub.f32 0.0, %v4347_v63  ;;  %v4349_v5 = vadd.f32 %v4348_v3, %v4308_v1  ;;  %v4350_v16 = vpop.f32.mrf.mxu1 }
 0x4ff   :  { %v4310_v9 = vpop.f32.mrf.mxu0 }
 0x500   :  { %v4448_v10 = vmul.f32 1.442695, %v4437_v35  ;;  %v4438_v11 = vsub.f32 0.0, %v4349_v5  ;;  %v4351_v12 = vpop.f32.mrf.mxu1 }
 0x502   :  { %5961 = vpow2.f32 %v4448_v10  ;;  %v4450_v13 = vmul.f32 1.442695, %v4438_v11 }
 0x504   :  { %5963 = vpow2.f32 %v4450_v13 }
 0x50f   :  { %v5962_v14 = vpop.eup %5961 }
 0x510   :  { %v4458_v17 = vadd.f32 1.0, %v5962_v14 }
 0x511   :  { %v5964_v26 = vpop.eup %5963 }
 0x512   :  { %5965 = vrcp.f32 %v4458_v17  ;;  %v4459_v22 = vadd.f32 1.0, %v5964_v26 }
 0x514   :  { %5967 = vrcp.f32 %v4459_v22 }
 0x519   :  { %v5090_v25 = vpop.f32.mrf.mxu0 }
 0x51a   :  { %v5112_v20 = vpop.f32.mrf.mxu1 }
 0x51b   :  { %v5091_v23 = vpop.f32.mrf.mxu0 }
 0x51c   :  { %v5092_v28 = vadd.f32 %v5091_v23, %v5090_v25  ;;  %v5113_v24 = vpop.f32.mrf.mxu1 }
 0x51d   :  { %v5093_v0 = vpop.f32.mrf.mxu0  ;;  %v5114_v2 = vadd.f32 %v5113_v24, %v5112_v20 }
 0x51e   :  { %v4388_v29 = vadd.f32 %v5092_v28, %v2947_v21  ;;  %v5115_v30 = vpop.f32.mrf.mxu1 }
 0x51f   :  { %v5966_v31 = vpop.eup %5965  ;;  %v5094_v32 = vpop.f32.mrf.mxu0 }
 0x520   :  { %4472 = vst [vmem:[#allocation16 + $0x20] sm:$0xff] %v5966_v31  ;;  %v4428_v33 = vadd.f32 %v5114_v2, %v4388_v29  ;;  %v5116_v51 = vpop.f32.mrf.mxu1 }
 0x521   :  { %v5968_v36 = vpop.eup %5967 }
 0x522   :  { %4473 = vst [vmem:[#allocation16 + $0x28] sm:$0xff] %v5968_v36  ;;  %v4439_v37 = vsub.f32 0.0, %v4428_v33 }
 0x524   :  { %v4452_v15 = vmul.f32 1.442695, %v4439_v37 }
 0x526   :  { %5969 = vpow2.f32 %v4452_v15 }
 0x533   :  { %v5970_v38 = vpop.eup %5969 }
 0x534   :  { %v4460_v39 = vadd.f32 1.0, %v5970_v38 }
 0x536   :  { %5971 = vrcp.f32 %v4460_v39 }
 0x543   :  { %v5972_v8 = vpop.eup %5971 }
 0x544   :  { %4474 = vst [vmem:[#allocation16 + $0x30] sm:$0xff] %v5972_v8 }
 0x545   :  { %6185 = shalt.err (!%p6182_p12)
}
 0x546   :  { %4486 = dma.vmem_to_hbm [thread:$0]  %s4484_s12, 896, %s6456_s10, [#allocation4]  }
 0x547   :  { %6204 = dma.done.wait [#allocation4], 896  }
 0x548   :  { %6205 = vsyncadd [#allocation4], 4294966400 }
 0x549   :  { %6206 = dma.done.wait [#allocation18], 256  }
 0x54a   :  { %6207 = vsyncadd [#allocation18], 4294967040 }
 0x54b   :  { %4516 = vsyncpa [#allocation3], 1 }
 0x54c   :  { %4517 = vsyncpa [#allocation6], 1 }
 0x54d   :  { %4518 = vsyncpa [#allocation9], 1 }
 0x54e   :  { %4519 = vsyncpa [#allocation12], 1 }
 0x54f   :  { %4520 = vsyncpa [#allocation15], 1 }
 0x550   :  { %4521 = vsyncpa [#allocation4], 1 }
 0x551   :  { %4522 = vsyncpa [#allocation18], 1 }

</bundles_post_ra>
